<compile_context>
chip_gen: v7x
topology: tpu7x:2x2x1
jax: 0.10.0
libtpu: 0.0.40
codegen_flags: <defaults>
</compile_context>

<pallas_src>
import jax
import jax.numpy as jnp
from jax.experimental import pallas as pl
from jax.experimental.pallas import tpu as pltpu


def _round_up(n, m):
    return ((n + m - 1) // m) * m


def lstm_recurrence_kernel(xw_ref, whh_ref, wout_ref, bout_ref, out_ref):
    # xw_ref  : (T, TB, 4*Hp)  precomputed input projection + LSTM bias (padded gate lanes = 0)
    # whh_ref : (Hp, 4*Hp)     recurrent weights, gate-aligned, zero-padded rows/cols
    # wout_ref: (Hp, Op)       final linear weights (zero-padded rows/cols)
    # bout_ref: (1, Op)        final linear bias (zero-padded lanes)
    # out_ref : (TB, Op)
    T, TB, _ = xw_ref.shape
    Hp = whh_ref.shape[0]

    h0 = jnp.zeros((TB, Hp), jnp.float32)
    c0 = jnp.zeros((TB, Hp), jnp.float32)

    def step(t, carry):
        h, c = carry
        # Only the recurrent matmul sits on the serial dependence chain.
        gates = xw_ref[t] + jnp.dot(h, whh_ref[...],
                                    preferred_element_type=jnp.float32)   # (TB, 4*Hp)
        # Hp is a multiple of 128 -> these slices are lane-tile aligned (free views).
        i_g = jax.nn.sigmoid(gates[:, 0 * Hp:1 * Hp])
        f_g = jax.nn.sigmoid(gates[:, 1 * Hp:2 * Hp])
        g_g = jnp.tanh(gates[:, 2 * Hp:3 * Hp])
        o_g = jax.nn.sigmoid(gates[:, 3 * Hp:4 * Hp])
        c_new = f_g * c + i_g * g_g
        h_new = o_g * jnp.tanh(c_new)
        return h_new, c_new

    # T is small & static: fully unroll so MXU work of step t+1 overlaps the EUP/VPU
    # tail of step t instead of paying the short-loop penalty.
    h_last, _ = jax.lax.fori_loop(0, T, step, (h0, c0), unroll=True)

    # Final linear on the last hidden state; (TB, Op) with Op a multiple of 128
    # -> unmasked lane-dense store.
    out_ref[...] = (jnp.dot(h_last, wout_ref[...], preferred_element_type=jnp.float32)
                    + bout_ref[...])


def lstm_forward(x, params):
    """x: (batch, seq, input) float32 -> (batch, output) float32.

    Matches: out, (h, c) = nn.LSTM(batch_first=True)(x); linear(out[:, -1, :])
    """
    B, T, I = x.shape
    H = params["w_hh"].shape[1]
    O = params["w_out"].shape[0]
    f32 = jnp.float32

    LANE, SUBLANE = 128, 8
    Hp = _round_up(H, LANE)       # per-gate lane padding -> aligned gate slices
    Op = _round_up(O, LANE)       # lane-dense output store
    TB = SUBLANE                  # batch tile: fill all 8 f32 sublanes per vreg
    Bp = _round_up(max(B, TB), TB)

    # ---- time-major, batch-padded input ---------------------------------------
    x_tm = jnp.transpose(x.astype(f32), (1, 0, 2))             # (T, B, I)
    x_tm = jnp.pad(x_tm, ((0, 0), (0, Bp - B), (0, 0)))        # (T, Bp, I)

    # ---- hoisted input projection (single XLA matmul, not on the serial chain) --
    w_ih_t = params["w_ih"].astype(f32).T                      # (I, 4H)
    bias = (params["b_ih"] + params["b_hh"]).astype(f32)       # (4H,)
    xw = jnp.einsum("tbi,ig->tbg", x_tm, w_ih_t) + bias        # (T, Bp, 4H)
    xw = xw.reshape(T, Bp, 4, H)
    xw = jnp.pad(xw, ((0, 0), (0, 0), (0, 0), (0, Hp - H)))    # zero padded gate lanes
    xw = xw.reshape(T, Bp, 4 * Hp)                             # (T, Bp, 4*Hp)

    # ---- gate-aligned, zero-padded recurrent weights ---------------------------
    # PyTorch w_hh: (4H, H) = (gate*out, in).  Build (Hp_in, 4*Hp_out) so that
    # h @ w_hh_p lands each gate in a 128-aligned column block; padded rows are zero
    # so padded h lanes can never contribute.
    w_hh = params["w_hh"].astype(f32).reshape(4, H, H)         # (gate, out, in)
    w_hh = jnp.transpose(w_hh, (2, 0, 1))                      # (in, gate, out)
    w_hh = jnp.pad(w_hh, ((0, Hp - H), (0, 0), (0, Hp - H)))   # (Hp, 4, Hp)
    w_hh_p = w_hh.reshape(Hp, 4 * Hp)

    # ---- final linear, padded to a lane-dense output head ----------------------
    w_out_p = jnp.zeros((Hp, Op), f32).at[:H, :O].set(params["w_out"].astype(f32).T)
    b_out_p = jnp.zeros((1, Op), f32).at[0, :O].set(params["b_out"].astype(f32))

    grid = (Bp // TB,)   # parallel batch tiles -> uses 2nd TensorCore on v7x at larger B
    out_p = pl.pallas_call(
        lstm_recurrence_kernel,
        out_shape=jax.ShapeDtypeStruct((Bp, Op), f32),
        grid_spec=pltpu.PrefetchScalarGridSpec(
            num_scalar_prefetch=0,
            grid=grid,
            in_specs=[
                pl.BlockSpec((T, TB, 4 * Hp), lambda b: (0, b, 0)),  # per-tile projection
                pl.BlockSpec((Hp, 4 * Hp), lambda b: (0, 0)),        # W_hh (shared)
                pl.BlockSpec((Hp, Op), lambda b: (0, 0)),            # W_out (shared)
                pl.BlockSpec((1, Op), lambda b: (0, 0)),             # b_out (shared)
            ],
            out_specs=pl.BlockSpec((TB, Op), lambda b: (b, 0)),
        ),
        compiler_params=pltpu.CompilerParams(
            dimension_semantics=("parallel",),
            vmem_limit_bytes=32 * 1024 * 1024,   # explicit budget; tiny actual footprint
        ),
    )(xw, w_hh_p, w_out_p, b_out_p)

    return out_p[:B, :O]


def lstm_reference(x, params):
    """Pure-JAX reference matching PyTorch nn.LSTM(batch_first=True) + Linear."""
    B, T, I = x.shape
    H = params["w_hh"].shape[1]
    w_ih_t = params["w_ih"].T
    w_hh_t = params["w_hh"].T
    bias = params["b_ih"] + params["b_hh"]

    def step(carry, x_t):
        h, c = carry
        gates = x_t @ w_ih_t + h @ w_hh_t + bias
        i_g = jax.nn.sigmoid(gates[:, 0 * H:1 * H])
        f_g = jax.nn.sigmoid(gates[:, 1 * H:2 * H])
        g_g = jnp.tanh(gates[:, 2 * H:3 * H])
        o_g = jax.nn.sigmoid(gates[:, 3 * H:4 * H])
        c_new = f_g * c + i_g * g_g
        h_new = o_g * jnp.tanh(c_new)
        return (h_new, c_new), None

    h0 = jnp.zeros((B, H), jnp.float32)
    c0 = jnp.zeros((B, H), jnp.float32)
    (h_last, _), _ = jax.lax.scan(step, (h0, c0), jnp.transpose(x, (1, 0, 2)))
    return h_last @ params["w_out"].T + params["b_out"]


if __name__ == "__main__":
    # Shapes consistent with the module defaults: input_size=1, hidden_layer_size=100,
    # output_size=1; small batch=2, seq=8.
    B, T, I, H, O = 2, 8, 1, 100, 1

    key = jax.random.PRNGKey(0)
    k = jax.random.split(key, 8)
    scale = 1.0 / jnp.sqrt(jnp.float32(H))  # PyTorch-style uniform(-1/sqrt(H), 1/sqrt(H))
    params = {
        "w_ih": jax.random.uniform(k[0], (4 * H, I), jnp.float32, -scale, scale),
        "w_hh": jax.random.uniform(k[1], (4 * H, H), jnp.float32, -scale, scale),
        "b_ih": jax.random.uniform(k[2], (4 * H,), jnp.float32, -scale, scale),
        "b_hh": jax.random.uniform(k[3], (4 * H,), jnp.float32, -scale, scale),
        "w_out": jax.random.uniform(k[4], (O, H), jnp.float32, -scale, scale),
        "b_out": jax.random.uniform(k[5], (O,), jnp.float32, -scale, scale),
    }
    x = jax.random.normal(k[6], (B, T, I), jnp.float32)

    out = lstm_forward(x, params)
    jax.block_until_ready(out)

    ref = lstm_reference(x, params)
    assert out.shape == (B, O)
    assert jnp.allclose(out, ref, atol=1e-4, rtol=1e-3), (out, ref)
    print("KERNEL_OK")
</pallas_src>

<mosaic_0001>
module attributes {stable_mosaic.version = 11 : i64} {
  func.func @lstm_recurrence_kernel(%arg0: i32, %arg1: memref<8x8x512xf32, #tpu.memory_space<vmem>>, %arg2: memref<128x512xf32, #tpu.memory_space<vmem>>, %arg3: memref<128x128xf32, #tpu.memory_space<vmem>>, %arg4: memref<1x128xf32, #tpu.memory_space<vmem>>, %arg5: memref<8x128xf32, #tpu.memory_space<vmem>>) attributes {dimension_semantics = [#tpu.dimension_semantics<parallel>], iteration_bounds = array<i64: 1>, scalar_prefetch = 0 : i64, scratch_operands = 0 : i64, tpu.core_type = #tpu.core_type<tc>, window_params = [{transform_indices = @transform_0, window_bounds = array<i64: 8, 8, 512>}, {pipeline_mode = #tpu.pipeline_mode<synchronous>, transform_indices = @transform_1, window_bounds = array<i64: 128, 512>}, {pipeline_mode = #tpu.pipeline_mode<synchronous>, transform_indices = @transform_2, window_bounds = array<i64: 128, 128>}, {pipeline_mode = #tpu.pipeline_mode<synchronous>, transform_indices = @transform_3, window_bounds = array<i64: 1, 128>}, {transform_indices = @transform_4, window_bounds = array<i64: 8, 128>}]} {
    %cst = arith.constant 0.000000e+00 : f32
    %0 = vector.broadcast %cst : f32 to vector<8x128xf32>
    %cst_0 = arith.constant 0.000000e+00 : f32
    %1 = vector.broadcast %cst_0 : f32 to vector<8x128xf32>
    %c0_i32 = arith.constant 0 : i32
    %2 = arith.index_cast %c0_i32 : i32 to index
    %c0 = arith.constant 0 : index
    %c0_1 = arith.constant 0 : index
    %3 = vector.load %arg1[%2, %c0, %c0_1] : memref<8x8x512xf32, #tpu.memory_space<vmem>>, vector<1x8x512xf32>
    %4 = vector.shape_cast %3 : vector<1x8x512xf32> to vector<8x512xf32>
    %c0_2 = arith.constant 0 : index
    %c0_3 = arith.constant 0 : index
    %5 = vector.load %arg2[%c0_2, %c0_3] : memref<128x512xf32, #tpu.memory_space<vmem>>, vector<128x512xf32>
    %cst_4 = arith.constant dense<0.000000e+00> : vector<8x512xf32>
    %6 = tpu.matmul %0, %5, %cst_4 {dimension_numbers = #tpu.dot_dimension_numbers<[1], [0], [0], [1], [0, 0, 1, 1], [], []>} : vector<8x128xf32>, vector<128x512xf32>, vector<8x512xf32> -> vector<8x512xf32>
    %7 = arith.addf %4, %6 : vector<8x512xf32>
    %8 = vector.extract_strided_slice %7 {offsets = [0, 0], sizes = [8, 128], strides = [1, 1]} : vector<8x512xf32> to vector<8x128xf32>
    %9 = arith.negf %8 : vector<8x128xf32>
    %10 = math.exp %9 : vector<8x128xf32>
    %cst_5 = arith.constant 1.000000e+00 : f32
    %11 = vector.broadcast %cst_5 : f32 to vector<8x128xf32>
    %12 = arith.addf %11, %10 : vector<8x128xf32>
    %13 = arith.divf %11, %12 : vector<8x128xf32>
    %14 = vector.extract_strided_slice %7 {offsets = [0, 128], sizes = [8, 128], strides = [1, 1]} : vector<8x512xf32> to vector<8x128xf32>
    %15 = arith.negf %14 : vector<8x128xf32>
    %16 = math.exp %15 : vector<8x128xf32>
    %cst_6 = arith.constant 1.000000e+00 : f32
    %17 = vector.broadcast %cst_6 : f32 to vector<8x128xf32>
    %18 = arith.addf %17, %16 : vector<8x128xf32>
    %19 = arith.divf %17, %18 : vector<8x128xf32>
    %20 = vector.extract_strided_slice %7 {offsets = [0, 256], sizes = [8, 128], strides = [1, 1]} : vector<8x512xf32> to vector<8x128xf32>
    %21 = math.tanh %20 : vector<8x128xf32>
    %22 = vector.extract_strided_slice %7 {offsets = [0, 384], sizes = [8, 128], strides = [1, 1]} : vector<8x512xf32> to vector<8x128xf32>
    %23 = arith.negf %22 : vector<8x128xf32>
    %24 = math.exp %23 : vector<8x128xf32>
    %cst_7 = arith.constant 1.000000e+00 : f32
    %25 = vector.broadcast %cst_7 : f32 to vector<8x128xf32>
    %26 = arith.addf %25, %24 : vector<8x128xf32>
    %27 = arith.divf %25, %26 : vector<8x128xf32>
    %28 = arith.mulf %19, %1 : vector<8x128xf32>
    %29 = arith.mulf %13, %21 : vector<8x128xf32>
    %30 = arith.addf %28, %29 : vector<8x128xf32>
    %31 = math.tanh %30 : vector<8x128xf32>
    %32 = arith.mulf %27, %31 : vector<8x128xf32>
    %c1_i32 = arith.constant 1 : i32
    %33 = arith.index_cast %c1_i32 : i32 to index
    %c0_8 = arith.constant 0 : index
    %c0_9 = arith.constant 0 : index
    %34 = vector.load %arg1[%33, %c0_8, %c0_9] : memref<8x8x512xf32, #tpu.memory_space<vmem>>, vector<1x8x512xf32>
    %35 = vector.shape_cast %34 : vector<1x8x512xf32> to vector<8x512xf32>
    %c0_10 = arith.constant 0 : index
    %c0_11 = arith.constant 0 : index
    %36 = vector.load %arg2[%c0_10, %c0_11] : memref<128x512xf32, #tpu.memory_space<vmem>>, vector<128x512xf32>
    %cst_12 = arith.constant dense<0.000000e+00> : vector<8x512xf32>
    %37 = tpu.matmul %32, %36, %cst_12 {dimension_numbers = #tpu.dot_dimension_numbers<[1], [0], [0], [1], [0, 0, 1, 1], [], []>} : vector<8x128xf32>, vector<128x512xf32>, vector<8x512xf32> -> vector<8x512xf32>
    %38 = arith.addf %35, %37 : vector<8x512xf32>
    %39 = vector.extract_strided_slice %38 {offsets = [0, 0], sizes = [8, 128], strides = [1, 1]} : vector<8x512xf32> to vector<8x128xf32>
    %40 = arith.negf %39 : vector<8x128xf32>
    %41 = math.exp %40 : vector<8x128xf32>
    %cst_13 = arith.constant 1.000000e+00 : f32
    %42 = vector.broadcast %cst_13 : f32 to vector<8x128xf32>
    %43 = arith.addf %42, %41 : vector<8x128xf32>
    %44 = arith.divf %42, %43 : vector<8x128xf32>
    %45 = vector.extract_strided_slice %38 {offsets = [0, 128], sizes = [8, 128], strides = [1, 1]} : vector<8x512xf32> to vector<8x128xf32>
    %46 = arith.negf %45 : vector<8x128xf32>
    %47 = math.exp %46 : vector<8x128xf32>
    %cst_14 = arith.constant 1.000000e+00 : f32
    %48 = vector.broadcast %cst_14 : f32 to vector<8x128xf32>
    %49 = arith.addf %48, %47 : vector<8x128xf32>
    %50 = arith.divf %48, %49 : vector<8x128xf32>
    %51 = vector.extract_strided_slice %38 {offsets = [0, 256], sizes = [8, 128], strides = [1, 1]} : vector<8x512xf32> to vector<8x128xf32>
    %52 = math.tanh %51 : vector<8x128xf32>
    %53 = vector.extract_strided_slice %38 {offsets = [0, 384], sizes = [8, 128], strides = [1, 1]} : vector<8x512xf32> to vector<8x128xf32>
    %54 = arith.negf %53 : vector<8x128xf32>
    %55 = math.exp %54 : vector<8x128xf32>
    %cst_15 = arith.constant 1.000000e+00 : f32
    %56 = vector.broadcast %cst_15 : f32 to vector<8x128xf32>
    %57 = arith.addf %56, %55 : vector<8x128xf32>
    %58 = arith.divf %56, %57 : vector<8x128xf32>
    %59 = arith.mulf %50, %30 : vector<8x128xf32>
    %60 = arith.mulf %44, %52 : vector<8x128xf32>
    %61 = arith.addf %59, %60 : vector<8x128xf32>
    %62 = math.tanh %61 : vector<8x128xf32>
    %63 = arith.mulf %58, %62 : vector<8x128xf32>
    %c2_i32 = arith.constant 2 : i32
    %64 = arith.index_cast %c2_i32 : i32 to index
    %c0_16 = arith.constant 0 : index
    %c0_17 = arith.constant 0 : index
    %65 = vector.load %arg1[%64, %c0_16, %c0_17] : memref<8x8x512xf32, #tpu.memory_space<vmem>>, vector<1x8x512xf32>
    %66 = vector.shape_cast %65 : vector<1x8x512xf32> to vector<8x512xf32>
    %c0_18 = arith.constant 0 : index
    %c0_19 = arith.constant 0 : index
    %67 = vector.load %arg2[%c0_18, %c0_19] : memref<128x512xf32, #tpu.memory_space<vmem>>, vector<128x512xf32>
    %cst_20 = arith.constant dense<0.000000e+00> : vector<8x512xf32>
    %68 = tpu.matmul %63, %67, %cst_20 {dimension_numbers = #tpu.dot_dimension_numbers<[1], [0], [0], [1], [0, 0, 1, 1], [], []>} : vector<8x128xf32>, vector<128x512xf32>, vector<8x512xf32> -> vector<8x512xf32>
    %69 = arith.addf %66, %68 : vector<8x512xf32>
    %70 = vector.extract_strided_slice %69 {offsets = [0, 0], sizes = [8, 128], strides = [1, 1]} : vector<8x512xf32> to vector<8x128xf32>
    %71 = arith.negf %70 : vector<8x128xf32>
    %72 = math.exp %71 : vector<8x128xf32>
    %cst_21 = arith.constant 1.000000e+00 : f32
    %73 = vector.broadcast %cst_21 : f32 to vector<8x128xf32>
    %74 = arith.addf %73, %72 : vector<8x128xf32>
    %75 = arith.divf %73, %74 : vector<8x128xf32>
    %76 = vector.extract_strided_slice %69 {offsets = [0, 128], sizes = [8, 128], strides = [1, 1]} : vector<8x512xf32> to vector<8x128xf32>
    %77 = arith.negf %76 : vector<8x128xf32>
    %78 = math.exp %77 : vector<8x128xf32>
    %cst_22 = arith.constant 1.000000e+00 : f32
    %79 = vector.broadcast %cst_22 : f32 to vector<8x128xf32>
    %80 = arith.addf %79, %78 : vector<8x128xf32>
    %81 = arith.divf %79, %80 : vector<8x128xf32>
    %82 = vector.extract_strided_slice %69 {offsets = [0, 256], sizes = [8, 128], strides = [1, 1]} : vector<8x512xf32> to vector<8x128xf32>
    %83 = math.tanh %82 : vector<8x128xf32>
    %84 = vector.extract_strided_slice %69 {offsets = [0, 384], sizes = [8, 128], strides = [1, 1]} : vector<8x512xf32> to vector<8x128xf32>
    %85 = arith.negf %84 : vector<8x128xf32>
    %86 = math.exp %85 : vector<8x128xf32>
    %cst_23 = arith.constant 1.000000e+00 : f32
    %87 = vector.broadcast %cst_23 : f32 to vector<8x128xf32>
    %88 = arith.addf %87, %86 : vector<8x128xf32>
    %89 = arith.divf %87, %88 : vector<8x128xf32>
    %90 = arith.mulf %81, %61 : vector<8x128xf32>
    %91 = arith.mulf %75, %83 : vector<8x128xf32>
    %92 = arith.addf %90, %91 : vector<8x128xf32>
    %93 = math.tanh %92 : vector<8x128xf32>
    %94 = arith.mulf %89, %93 : vector<8x128xf32>
    %c3_i32 = arith.constant 3 : i32
    %95 = arith.index_cast %c3_i32 : i32 to index
    %c0_24 = arith.constant 0 : index
    %c0_25 = arith.constant 0 : index
    %96 = vector.load %arg1[%95, %c0_24, %c0_25] : memref<8x8x512xf32, #tpu.memory_space<vmem>>, vector<1x8x512xf32>
    %97 = vector.shape_cast %96 : vector<1x8x512xf32> to vector<8x512xf32>
    %c0_26 = arith.constant 0 : index
    %c0_27 = arith.constant 0 : index
    %98 = vector.load %arg2[%c0_26, %c0_27] : memref<128x512xf32, #tpu.memory_space<vmem>>, vector<128x512xf32>
    %cst_28 = arith.constant dense<0.000000e+00> : vector<8x512xf32>
    %99 = tpu.matmul %94, %98, %cst_28 {dimension_numbers = #tpu.dot_dimension_numbers<[1], [0], [0], [1], [0, 0, 1, 1], [], []>} : vector<8x128xf32>, vector<128x512xf32>, vector<8x512xf32> -> vector<8x512xf32>
    %100 = arith.addf %97, %99 : vector<8x512xf32>
    %101 = vector.extract_strided_slice %100 {offsets = [0, 0], sizes = [8, 128], strides = [1, 1]} : vector<8x512xf32> to vector<8x128xf32>
    %102 = arith.negf %101 : vector<8x128xf32>
    %103 = math.exp %102 : vector<8x128xf32>
    %cst_29 = arith.constant 1.000000e+00 : f32
    %104 = vector.broadcast %cst_29 : f32 to vector<8x128xf32>
    %105 = arith.addf %104, %103 : vector<8x128xf32>
    %106 = arith.divf %104, %105 : vector<8x128xf32>
    %107 = vector.extract_strided_slice %100 {offsets = [0, 128], sizes = [8, 128], strides = [1, 1]} : vector<8x512xf32> to vector<8x128xf32>
    %108 = arith.negf %107 : vector<8x128xf32>
    %109 = math.exp %108 : vector<8x128xf32>
    %cst_30 = arith.constant 1.000000e+00 : f32
    %110 = vector.broadcast %cst_30 : f32 to vector<8x128xf32>
    %111 = arith.addf %110, %109 : vector<8x128xf32>
    %112 = arith.divf %110, %111 : vector<8x128xf32>
    %113 = vector.extract_strided_slice %100 {offsets = [0, 256], sizes = [8, 128], strides = [1, 1]} : vector<8x512xf32> to vector<8x128xf32>
    %114 = math.tanh %113 : vector<8x128xf32>
    %115 = vector.extract_strided_slice %100 {offsets = [0, 384], sizes = [8, 128], strides = [1, 1]} : vector<8x512xf32> to vector<8x128xf32>
    %116 = arith.negf %115 : vector<8x128xf32>
    %117 = math.exp %116 : vector<8x128xf32>
    %cst_31 = arith.constant 1.000000e+00 : f32
    %118 = vector.broadcast %cst_31 : f32 to vector<8x128xf32>
    %119 = arith.addf %118, %117 : vector<8x128xf32>
    %120 = arith.divf %118, %119 : vector<8x128xf32>
    %121 = arith.mulf %112, %92 : vector<8x128xf32>
    %122 = arith.mulf %106, %114 : vector<8x128xf32>
    %123 = arith.addf %121, %122 : vector<8x128xf32>
    %124 = math.tanh %123 : vector<8x128xf32>
    %125 = arith.mulf %120, %124 : vector<8x128xf32>
    %c4_i32 = arith.constant 4 : i32
    %126 = arith.index_cast %c4_i32 : i32 to index
    %c0_32 = arith.constant 0 : index
    %c0_33 = arith.constant 0 : index
    %127 = vector.load %arg1[%126, %c0_32, %c0_33] : memref<8x8x512xf32, #tpu.memory_space<vmem>>, vector<1x8x512xf32>
    %128 = vector.shape_cast %127 : vector<1x8x512xf32> to vector<8x512xf32>
    %c0_34 = arith.constant 0 : index
    %c0_35 = arith.constant 0 : index
    %129 = vector.load %arg2[%c0_34, %c0_35] : memref<128x512xf32, #tpu.memory_space<vmem>>, vector<128x512xf32>
    %cst_36 = arith.constant dense<0.000000e+00> : vector<8x512xf32>
    %130 = tpu.matmul %125, %129, %cst_36 {dimension_numbers = #tpu.dot_dimension_numbers<[1], [0], [0], [1], [0, 0, 1, 1], [], []>} : vector<8x128xf32>, vector<128x512xf32>, vector<8x512xf32> -> vector<8x512xf32>
    %131 = arith.addf %128, %130 : vector<8x512xf32>
    %132 = vector.extract_strided_slice %131 {offsets = [0, 0], sizes = [8, 128], strides = [1, 1]} : vector<8x512xf32> to vector<8x128xf32>
    %133 = arith.negf %132 : vector<8x128xf32>
    %134 = math.exp %133 : vector<8x128xf32>
    %cst_37 = arith.constant 1.000000e+00 : f32
    %135 = vector.broadcast %cst_37 : f32 to vector<8x128xf32>
    %136 = arith.addf %135, %134 : vector<8x128xf32>
    %137 = arith.divf %135, %136 : vector<8x128xf32>
    %138 = vector.extract_strided_slice %131 {offsets = [0, 128], sizes = [8, 128], strides = [1, 1]} : vector<8x512xf32> to vector<8x128xf32>
    %139 = arith.negf %138 : vector<8x128xf32>
    %140 = math.exp %139 : vector<8x128xf32>
    %cst_38 = arith.constant 1.000000e+00 : f32
    %141 = vector.broadcast %cst_38 : f32 to vector<8x128xf32>
    %142 = arith.addf %141, %140 : vector<8x128xf32>
    %143 = arith.divf %141, %142 : vector<8x128xf32>
    %144 = vector.extract_strided_slice %131 {offsets = [0, 256], sizes = [8, 128], strides = [1, 1]} : vector<8x512xf32> to vector<8x128xf32>
    %145 = math.tanh %144 : vector<8x128xf32>
    %146 = vector.extract_strided_slice %131 {offsets = [0, 384], sizes = [8, 128], strides = [1, 1]} : vector<8x512xf32> to vector<8x128xf32>
    %147 = arith.negf %146 : vector<8x128xf32>
    %148 = math.exp %147 : vector<8x128xf32>
    %cst_39 = arith.constant 1.000000e+00 : f32
    %149 = vector.broadcast %cst_39 : f32 to vector<8x128xf32>
    %150 = arith.addf %149, %148 : vector<8x128xf32>
    %151 = arith.divf %149, %150 : vector<8x128xf32>
    %152 = arith.mulf %143, %123 : vector<8x128xf32>
    %153 = arith.mulf %137, %145 : vector<8x128xf32>
    %154 = arith.addf %152, %153 : vector<8x128xf32>
    %155 = math.tanh %154 : vector<8x128xf32>
    %156 = arith.mulf %151, %155 : vector<8x128xf32>
    %c5_i32 = arith.constant 5 : i32
    %157 = arith.index_cast %c5_i32 : i32 to index
    %c0_40 = arith.constant 0 : index
    %c0_41 = arith.constant 0 : index
    %158 = vector.load %arg1[%157, %c0_40, %c0_41] : memref<8x8x512xf32, #tpu.memory_space<vmem>>, vector<1x8x512xf32>
    %159 = vector.shape_cast %158 : vector<1x8x512xf32> to vector<8x512xf32>
    %c0_42 = arith.constant 0 : index
    %c0_43 = arith.constant 0 : index
    %160 = vector.load %arg2[%c0_42, %c0_43] : memref<128x512xf32, #tpu.memory_space<vmem>>, vector<128x512xf32>
    %cst_44 = arith.constant dense<0.000000e+00> : vector<8x512xf32>
    %161 = tpu.matmul %156, %160, %cst_44 {dimension_numbers = #tpu.dot_dimension_numbers<[1], [0], [0], [1], [0, 0, 1, 1], [], []>} : vector<8x128xf32>, vector<128x512xf32>, vector<8x512xf32> -> vector<8x512xf32>
    %162 = arith.addf %159, %161 : vector<8x512xf32>
    %163 = vector.extract_strided_slice %162 {offsets = [0, 0], sizes = [8, 128], strides = [1, 1]} : vector<8x512xf32> to vector<8x128xf32>
    %164 = arith.negf %163 : vector<8x128xf32>
    %165 = math.exp %164 : vector<8x128xf32>
    %cst_45 = arith.constant 1.000000e+00 : f32
    %166 = vector.broadcast %cst_45 : f32 to vector<8x128xf32>
    %167 = arith.addf %166, %165 : vector<8x128xf32>
    %168 = arith.divf %166, %167 : vector<8x128xf32>
    %169 = vector.extract_strided_slice %162 {offsets = [0, 128], sizes = [8, 128], strides = [1, 1]} : vector<8x512xf32> to vector<8x128xf32>
    %170 = arith.negf %169 : vector<8x128xf32>
    %171 = math.exp %170 : vector<8x128xf32>
    %cst_46 = arith.constant 1.000000e+00 : f32
    %172 = vector.broadcast %cst_46 : f32 to vector<8x128xf32>
    %173 = arith.addf %172, %171 : vector<8x128xf32>
    %174 = arith.divf %172, %173 : vector<8x128xf32>
    %175 = vector.extract_strided_slice %162 {offsets = [0, 256], sizes = [8, 128], strides = [1, 1]} : vector<8x512xf32> to vector<8x128xf32>
    %176 = math.tanh %175 : vector<8x128xf32>
    %177 = vector.extract_strided_slice %162 {offsets = [0, 384], sizes = [8, 128], strides = [1, 1]} : vector<8x512xf32> to vector<8x128xf32>
    %178 = arith.negf %177 : vector<8x128xf32>
    %179 = math.exp %178 : vector<8x128xf32>
    %cst_47 = arith.constant 1.000000e+00 : f32
    %180 = vector.broadcast %cst_47 : f32 to vector<8x128xf32>
    %181 = arith.addf %180, %179 : vector<8x128xf32>
    %182 = arith.divf %180, %181 : vector<8x128xf32>
    %183 = arith.mulf %174, %154 : vector<8x128xf32>
    %184 = arith.mulf %168, %176 : vector<8x128xf32>
    %185 = arith.addf %183, %184 : vector<8x128xf32>
    %186 = math.tanh %185 : vector<8x128xf32>
    %187 = arith.mulf %182, %186 : vector<8x128xf32>
    %c6_i32 = arith.constant 6 : i32
    %188 = arith.index_cast %c6_i32 : i32 to index
    %c0_48 = arith.constant 0 : index
    %c0_49 = arith.constant 0 : index
    %189 = vector.load %arg1[%188, %c0_48, %c0_49] : memref<8x8x512xf32, #tpu.memory_space<vmem>>, vector<1x8x512xf32>
    %190 = vector.shape_cast %189 : vector<1x8x512xf32> to vector<8x512xf32>
    %c0_50 = arith.constant 0 : index
    %c0_51 = arith.constant 0 : index
    %191 = vector.load %arg2[%c0_50, %c0_51] : memref<128x512xf32, #tpu.memory_space<vmem>>, vector<128x512xf32>
    %cst_52 = arith.constant dense<0.000000e+00> : vector<8x512xf32>
    %192 = tpu.matmul %187, %191, %cst_52 {dimension_numbers = #tpu.dot_dimension_numbers<[1], [0], [0], [1], [0, 0, 1, 1], [], []>} : vector<8x128xf32>, vector<128x512xf32>, vector<8x512xf32> -> vector<8x512xf32>
    %193 = arith.addf %190, %192 : vector<8x512xf32>
    %194 = vector.extract_strided_slice %193 {offsets = [0, 0], sizes = [8, 128], strides = [1, 1]} : vector<8x512xf32> to vector<8x128xf32>
    %195 = arith.negf %194 : vector<8x128xf32>
    %196 = math.exp %195 : vector<8x128xf32>
    %cst_53 = arith.constant 1.000000e+00 : f32
    %197 = vector.broadcast %cst_53 : f32 to vector<8x128xf32>
    %198 = arith.addf %197, %196 : vector<8x128xf32>
    %199 = arith.divf %197, %198 : vector<8x128xf32>
    %200 = vector.extract_strided_slice %193 {offsets = [0, 128], sizes = [8, 128], strides = [1, 1]} : vector<8x512xf32> to vector<8x128xf32>
    %201 = arith.negf %200 : vector<8x128xf32>
    %202 = math.exp %201 : vector<8x128xf32>
    %cst_54 = arith.constant 1.000000e+00 : f32
    %203 = vector.broadcast %cst_54 : f32 to vector<8x128xf32>
    %204 = arith.addf %203, %202 : vector<8x128xf32>
    %205 = arith.divf %203, %204 : vector<8x128xf32>
    %206 = vector.extract_strided_slice %193 {offsets = [0, 256], sizes = [8, 128], strides = [1, 1]} : vector<8x512xf32> to vector<8x128xf32>
    %207 = math.tanh %206 : vector<8x128xf32>
    %208 = vector.extract_strided_slice %193 {offsets = [0, 384], sizes = [8, 128], strides = [1, 1]} : vector<8x512xf32> to vector<8x128xf32>
    %209 = arith.negf %208 : vector<8x128xf32>
    %210 = math.exp %209 : vector<8x128xf32>
    %cst_55 = arith.constant 1.000000e+00 : f32
    %211 = vector.broadcast %cst_55 : f32 to vector<8x128xf32>
    %212 = arith.addf %211, %210 : vector<8x128xf32>
    %213 = arith.divf %211, %212 : vector<8x128xf32>
    %214 = arith.mulf %205, %185 : vector<8x128xf32>
    %215 = arith.mulf %199, %207 : vector<8x128xf32>
    %216 = arith.addf %214, %215 : vector<8x128xf32>
    %217 = math.tanh %216 : vector<8x128xf32>
    %218 = arith.mulf %213, %217 : vector<8x128xf32>
    %c7_i32 = arith.constant 7 : i32
    %219 = arith.index_cast %c7_i32 : i32 to index
    %c0_56 = arith.constant 0 : index
    %c0_57 = arith.constant 0 : index
    %220 = vector.load %arg1[%219, %c0_56, %c0_57] : memref<8x8x512xf32, #tpu.memory_space<vmem>>, vector<1x8x512xf32>
    %221 = vector.shape_cast %220 : vector<1x8x512xf32> to vector<8x512xf32>
    %c0_58 = arith.constant 0 : index
    %c0_59 = arith.constant 0 : index
    %222 = vector.load %arg2[%c0_58, %c0_59] : memref<128x512xf32, #tpu.memory_space<vmem>>, vector<128x512xf32>
    %cst_60 = arith.constant dense<0.000000e+00> : vector<8x512xf32>
    %223 = tpu.matmul %218, %222, %cst_60 {dimension_numbers = #tpu.dot_dimension_numbers<[1], [0], [0], [1], [0, 0, 1, 1], [], []>} : vector<8x128xf32>, vector<128x512xf32>, vector<8x512xf32> -> vector<8x512xf32>
    %224 = arith.addf %221, %223 : vector<8x512xf32>
    %225 = vector.extract_strided_slice %224 {offsets = [0, 0], sizes = [8, 128], strides = [1, 1]} : vector<8x512xf32> to vector<8x128xf32>
    %226 = arith.negf %225 : vector<8x128xf32>
    %227 = math.exp %226 : vector<8x128xf32>
    %cst_61 = arith.constant 1.000000e+00 : f32
    %228 = vector.broadcast %cst_61 : f32 to vector<8x128xf32>
    %229 = arith.addf %228, %227 : vector<8x128xf32>
    %230 = arith.divf %228, %229 : vector<8x128xf32>
    %231 = vector.extract_strided_slice %224 {offsets = [0, 128], sizes = [8, 128], strides = [1, 1]} : vector<8x512xf32> to vector<8x128xf32>
    %232 = arith.negf %231 : vector<8x128xf32>
    %233 = math.exp %232 : vector<8x128xf32>
    %cst_62 = arith.constant 1.000000e+00 : f32
    %234 = vector.broadcast %cst_62 : f32 to vector<8x128xf32>
    %235 = arith.addf %234, %233 : vector<8x128xf32>
    %236 = arith.divf %234, %235 : vector<8x128xf32>
    %237 = vector.extract_strided_slice %224 {offsets = [0, 256], sizes = [8, 128], strides = [1, 1]} : vector<8x512xf32> to vector<8x128xf32>
    %238 = math.tanh %237 : vector<8x128xf32>
    %239 = vector.extract_strided_slice %224 {offsets = [0, 384], sizes = [8, 128], strides = [1, 1]} : vector<8x512xf32> to vector<8x128xf32>
    %240 = arith.negf %239 : vector<8x128xf32>
    %241 = math.exp %240 : vector<8x128xf32>
    %cst_63 = arith.constant 1.000000e+00 : f32
    %242 = vector.broadcast %cst_63 : f32 to vector<8x128xf32>
    %243 = arith.addf %242, %241 : vector<8x128xf32>
    %244 = arith.divf %242, %243 : vector<8x128xf32>
    %245 = arith.mulf %236, %216 : vector<8x128xf32>
    %246 = arith.mulf %230, %238 : vector<8x128xf32>
    %247 = arith.addf %245, %246 : vector<8x128xf32>
    %248 = math.tanh %247 : vector<8x128xf32>
    %249 = arith.mulf %244, %248 : vector<8x128xf32>
    %c8_i32 = arith.constant 8 : i32
    %c0_64 = arith.constant 0 : index
    %c0_65 = arith.constant 0 : index
    %250 = vector.load %arg3[%c0_64, %c0_65] : memref<128x128xf32, #tpu.memory_space<vmem>>, vector<128x128xf32>
    %cst_66 = arith.constant dense<0.000000e+00> : vector<8x128xf32>
    %251 = tpu.matmul %249, %250, %cst_66 {dimension_numbers = #tpu.dot_dimension_numbers<[1], [0], [0], [1], [0, 0, 1, 1], [], []>} : vector<8x128xf32>, vector<128x128xf32>, vector<8x128xf32> -> vector<8x128xf32>
    %c0_67 = arith.constant 0 : index
    %c0_68 = arith.constant 0 : index
    %252 = vector.load %arg4[%c0_67, %c0_68] : memref<1x128xf32, #tpu.memory_space<vmem>>, vector<1x128xf32>
    %253 = vector.broadcast %252 : vector<1x128xf32> to vector<8x128xf32>
    %254 = arith.addf %251, %253 : vector<8x128xf32>
    %c0_69 = arith.constant 0 : index
    %c0_70 = arith.constant 0 : index
    %255 = vector.load %arg5[%c0_69, %c0_70] : memref<8x128xf32, #tpu.memory_space<vmem>>, vector<8x128xf32>
    tpu.vector_store %arg5[%c0_69, %c0_70], %254 {strides = array<i32>} : memref<8x128xf32, #tpu.memory_space<vmem>>, vector<8x128xf32>,
    return
  }
  func.func @transform_0(%arg0: i32) -> (i32, i32, i32) {
    %c0_i32 = arith.constant 0 : i32
    %c0_i32_0 = arith.constant 0 : i32
    %c0_i32_1 = arith.constant 0 : i32
    return %c0_i32, %arg0, %c0_i32_0 : i32, i32, i32
  }
  func.func @transform_1(%arg0: i32) -> (i32, i32) {
    %c0_i32 = arith.constant 0 : i32
    %c0_i32_0 = arith.constant 0 : i32
    %c0_i32_1 = arith.constant 0 : i32
    return %c0_i32, %c0_i32_0 : i32, i32
  }
  func.func @transform_2(%arg0: i32) -> (i32, i32) {
    %c0_i32 = arith.constant 0 : i32
    %c0_i32_0 = arith.constant 0 : i32
    %c0_i32_1 = arith.constant 0 : i32
    return %c0_i32, %c0_i32_0 : i32, i32
  }
  func.func @transform_3(%arg0: i32) -> (i32, i32) {
    %c0_i32 = arith.constant 0 : i32
    %c0_i32_0 = arith.constant 0 : i32
    %c0_i32_1 = arith.constant 0 : i32
    return %c0_i32, %c0_i32_0 : i32, i32
  }
  func.func @transform_4(%arg0: i32) -> (i32, i32) {
    %c0_i32 = arith.constant 0 : i32
    %c0_i32_0 = arith.constant 0 : i32
    return %arg0, %c0_i32 : i32, i32
  }
}

</mosaic_0001>

<bundles_post_ra>
// kernel: tpu_custom_call.1
= control target key start
LH: loop header
LB: loop body
LE: loop exit
PB: predicated region body
PF: predicated region fallthrough
CT: control target
= control target key end

     0   :  { %9 = vsyncpa [#allocation3], 0  ;;  %s2939_s0 = inlined_call_operand.hbm [shape: f32[8,8,512], index: 0, kind: input, shape index: {}]   ;;  %s2940_s1 = inlined_call_operand.hbm [shape: f32[128,512], index: 1, kind: input, shape index: {}]   ;;  %s2941_s2 = inlined_call_operand.hbm [shape: f32[128,128], index: 2, kind: input, shape index: {}]   ;;  %s2942_s3 = inlined_call_operand.vmem [shape: f32[1,128], index: 3, kind: input, shape index: {}]   ;;  %s2943_s4 = inlined_call_operand.hbm [shape: f32[8,128], index: 4, kind: output, shape index: {}]  }
   0x1   :  { %10 = vsyncpa [#allocation6], 0 }
   0x2   :  { %11 = vsyncpa [#allocation4], 0  ;;  %s2478_s15 = smov [#allocation5]   ;;  %s2479_s17 = smov [#allocation2]  }
   0x3   :  { %s29_s16 = sshll.u32 %s2478_s15, 4  ;;  %s17_s18 = sshll.u32 %s2479_s17, 4  ;;  %s30_s16 = int_to_ptr.vmem [resolvable:$true] %s29_s16  ;;  %s2514_s18 = int_to_ptr.vmem [resolvable:$true] %s17_s18 }
   0x4   :  { %s2384_s21 = scalar_lea.hbm %s2940_s1, 8192 }
   0x5   :  { %p2385_p0 = scmp.ne.s32.totalorder %s2940_s1, %s2384_s21  ;;  %p2388_p1 = scmp.lt.u32.totalorder %s2384_s21, %s2940_s1 }
   0x7   :  { %p2390_p2 = pnand %p2388_p1, %p2385_p0 }
   0x9   :  { %2393 = shalt.err (!%p2390_p2)
}
   0xa   :  { %s2394_s26 = scalar_lea.vmem %s30_s16, 8192  ;;  %p2399_p4 = scmp.lt.s32.totalorder %s30_s16, %s30_s16 }
   0xb   :  { %p2395_p3 = scmp.ne.s32.totalorder %s30_s16, %s2394_s26  ;;  %p2400_p5 = scmp.lt.s32.totalorder %s2394_s26, %s2394_s26 }
   0xd   :  { %p2401_p6 = por %p2400_p5, %p2399_p4 }
   0xf   :  { %p2402_p7 = pnand %p2401_p6, %p2395_p3 }
  0x11   :  { %2405 = shalt.err (!%p2402_p7)
}
  0x12   :  { %s2480_s27 = smov 512   ;;  %s2481_s28 = smov 32  }
  0x13   :  { %35 = dma.hbm_to_vmem [thread:$0]  %s2940_s1, 8192, %s30_s16, [#allocation6], %s2480_s27, %s2480_s27, %s2481_s28  }
  0x14   :  { %s2406_s7 = scalar_lea.hbm %s2939_s0, 4096 }
  0x15   :  { %p2407_p8 = scmp.ne.s32.totalorder %s2939_s0, %s2406_s7  ;;  %p2410_p9 = scmp.lt.u32.totalorder %s2406_s7, %s2939_s0 }
  0x17   :  { %p2412_p10 = pnand %p2410_p9, %p2407_p8 }
  0x19   :  { %2415 = shalt.err (!%p2412_p10)
}
  0x1a   :  { %s2416_s12 = scalar_lea.vmem %s2514_s18, 4096  ;;  %p2421_p12 = scmp.lt.s32.totalorder %s2514_s18, %s2514_s18 }
  0x1b   :  { %p2417_p11 = scmp.ne.s32.totalorder %s2514_s18, %s2416_s12  ;;  %p2422_p13 = scmp.lt.s32.totalorder %s2416_s12, %s2416_s12 }
  0x1d   :  { %p2423_p0 = por %p2422_p13, %p2421_p12 }
  0x1f   :  { %p2424_p1 = pnand %p2423_p0, %p2417_p11 }
  0x21   :  { %2427 = shalt.err (!%p2424_p1)
}
  0x22   :  { %23 = dma.hbm_to_vmem [thread:$0]  %s2939_s0, 4096, %s2514_s18, [#allocation3], %s2480_s27, %s2480_s27, %s2481_s28  }
  0x23   :  { %s2482_s14 = smov [#allocation7]   ;;  %s2428_s19 = scalar_lea.hbm %s2941_s2, 2048 }
  0x24   :  { %s41_s15 = sshll.u32 %s2482_s14, 4  ;;  %p2429_p2 = scmp.ne.s32.totalorder %s2941_s2, %s2428_s19  ;;  %s42_s15 = int_to_ptr.vmem [resolvable:$true] %s41_s15 }
  0x25   :  { %p2432_p3 = scmp.lt.u32.totalorder %s2428_s19, %s2941_s2 }
  0x27   :  { %p2434_p4 = pnand %p2432_p3, %p2429_p2 }
  0x29   :  { %2437 = shalt.err (!%p2434_p4)
}
  0x2a   :  { %s2438_s24 = scalar_lea.vmem %s42_s15, 2048  ;;  %p2443_p6 = scmp.lt.s32.totalorder %s42_s15, %s42_s15 }
  0x2b   :  { %p2439_p5 = scmp.ne.s32.totalorder %s42_s15, %s2438_s24  ;;  %p2444_p7 = scmp.lt.s32.totalorder %s2438_s24, %s2438_s24 }
  0x2d   :  { %p2445_p8 = por %p2444_p7, %p2443_p6 }
  0x2f   :  { %p2446_p9 = pnand %p2445_p8, %p2439_p5 }
  0x31   :  { %2449 = shalt.err (!%p2446_p9)
}
  0x32   :  { %s2483_s0 = smov 128   ;;  %s2484_s18 = smov 8  }
  0x33   :  { %47 = dma.hbm_to_vmem [thread:$0]  %s2941_s2, 2048, %s42_s15, [#allocation6], %s2483_s0, %s2483_s0, %s2484_s18  }
  0x34   :  { %2472 = dma.done.wait [#allocation3], 4096  }
  0x35   :  { %2473 = vsyncadd [#allocation3], 4294963200 }
  0x36   :  { %2474 = dma.done.wait [#allocation6], 10240  }
  0x37   :  { %2475 = vsyncadd [#allocation6], 4294957056  ;;  %v2485_v0 = vmov 0.0   ;;  %v64_v1 = vld [vmem:[#allocation5 + $0x8] sm:$0xff]  ;;  %v63_v3 = vld [vmem:[#allocation5] sm:$0xff]  ;;  %vm2487_vm0 = vmmov 0  }
  0x38   :  { %191 = vmatprep.mubr.f32.mxu0 %v2485_v0  ;;  %262 = vmatprep.mubr.f32.mxu1 %v2485_v0  ;;  %v68_v2 = vld [vmem:[#allocation5 + $0x28] sm:$0xff]  ;;  %v67_v5 = vld [vmem:[#allocation5 + $0x20] sm:$0xff]  ;;  %v66_v19 = vld [vmem:[#allocation5 + $0x18] sm:$0xff]  ;;  %s2488_s28 = smov [#allocation8]  }
  0x39   :  { %v2559_v4 = vpack.c.bf16 %v68_v2, %v64_v1  ;;  %v72_v6 = vld [vmem:[#allocation5 + $0x48] sm:$0xff]  ;;  %v2561_v8 = vpack.c.bf16 %v67_v5, %v63_v3  ;;  %v71_v10 = vld [vmem:[#allocation5 + $0x40] sm:$0xff]  ;;  %v70_v20 = vld [vmem:[#allocation5 + $0x38] sm:$0xff]  ;;  %s1622_s29 = sshll.u32 %s2488_s28, 4  ;;  %s1623_s29 = int_to_ptr.vmem [resolvable:$true] %s1622_s29 }
  0x3a   :  { %v76_v7 = vld [vmem:[#allocation5 + $0x68] sm:$0xff]  ;;  %v75_v11 = vld [vmem:[#allocation5 + $0x60] sm:$0xff]  ;;  %v2572_v22 = vpack.c.bf16 %v70_v20, %v66_v19  ;;  %v65_v23 = vld [vmem:[#allocation5 + $0x10] sm:$0xff]  ;;  %s2450_s30 = scalar_lea.vmem %s1623_s29, 128  ;;  %p2455_p11 = scmp.lt.s32.totalorder %s1623_s29, %s1623_s29 }
  0x3b   :  { %v2563_v9 = vpack.c.bf16 %v76_v7, %v72_v6  ;;  %v80_v12 = vld [vmem:[#allocation5 + $0x88] sm:$0xff]  ;;  %1710 = vmatprep.subr.bf16.mxu0 %v2559_v4  ;;  %v2567_v14 = vpack.c.bf16 %v75_v11, %v71_v10  ;;  %v79_v15 = vld [vmem:[#allocation5 + $0x80] sm:$0xff]  ;;  %v69_v24 = vld [vmem:[#allocation5 + $0x30] sm:$0xff]  ;;  %p2451_p10 = scmp.ne.s32.totalorder %s1623_s29, %s2450_s30  ;;  %p2456_p12 = scmp.lt.s32.totalorder %s2450_s30, %s2450_s30 }
  0x3c   :  { %v84_v13 = vld [vmem:[#allocation5 + $0xa8] sm:$0xff]  ;;  %1712 = vmatpush1.bf16.msra.mxu0 %v2561_v8  ;;  %v83_v16 = vld [vmem:[#allocation5 + $0xa0] sm:$0xff]  ;;  %v2574_v25 = vpack.c.bf16 %v69_v24, %v65_v23  ;;  %1742 = vmatprep.subr.bf16.mxu1 %v2572_v22  ;;  %v74_v27 = vld [vmem:[#allocation5 + $0x58] sm:$0xff] }
  0x3d   :  { %1714 = vmatprep.subr.bf16.mxu0 %v2563_v9  ;;  %v2570_v17 = vpack.c.bf16 %v84_v13, %v80_v12  ;;  %v88_v18 = vld [vmem:[#allocation5 + $0xc8] sm:$0xff]  ;;  %v2577_v26 = vpack.c.bf16 %v83_v16, %v79_v15  ;;  %v78_v28 = vld [vmem:[#allocation5 + $0x78] sm:$0xff]  ;;  %v73_v29 = vld [vmem:[#allocation5 + $0x50] sm:$0xff]  ;;  %p2457_p13 = por %p2456_p12, %p2455_p11 }
  0x3e   :  { %v92_v21 = vld [vmem:[#allocation5 + $0xe8] sm:$0xff]  ;;  %v87_v31 = vld [vmem:[#allocation5 + $0xc0] sm:$0xff]  ;;  %1744 = vmatpush1.bf16.msra.mxu1 %v2574_v25  ;;  %v2584_v33 = vpack.c.bf16 %v78_v28, %v74_v27  ;;  %v77_v34 = vld [vmem:[#allocation5 + $0x70] sm:$0xff] }
  0x3f   :  { %v2581_v30 = vpack.c.bf16 %v92_v21, %v88_v18  ;;  %v91_v32 = vld [vmem:[#allocation5 + $0xe0] sm:$0xff]  ;;  %v96_v35 = vld [vmem:[#allocation5 + $0x108] sm:$0xff]  ;;  %v2586_v37 = vpack.c.bf16 %v77_v34, %v73_v29  ;;  %v82_v38 = vld [vmem:[#allocation5 + $0x98] sm:$0xff]  ;;  %p2458_p0 = pnand %p2457_p13, %p2451_p10 }
  0x40   :  { %1716 = vmatpush1.bf16.msra.mxu0 %v2567_v14  ;;  %v100_v36 = vld [vmem:[#allocation5 + $0x128] sm:$0xff]  ;;  %1746 = vmatprep.subr.bf16.mxu1 %v2584_v33  ;;  %v86_v39 = vld [vmem:[#allocation5 + $0xb8] sm:$0xff]  ;;  %v81_v40 = vld [vmem:[#allocation5 + $0x90] sm:$0xff]  ;;  %v2590_v42 = vpack.c.bf16 %v91_v32, %v87_v31 }
  0x41   :  { %1718 = vmatprep.subr.bf16.mxu0 %v2570_v17  ;;  %v85_v41 = vld [vmem:[#allocation5 + $0xb0] sm:$0xff]  ;;  %v95_v43 = vld [vmem:[#allocation5 + $0x100] sm:$0xff]  ;;  %v2592_v45 = vpack.c.bf16 %v86_v39, %v82_v38  ;;  %v2595_v46 = vpack.c.bf16 %v100_v36, %v96_v35  ;;  %v104_v47 = vld [vmem:[#allocation5 + $0x148] sm:$0xff] }
  0x42   :  { %v99_v44 = vld [vmem:[#allocation5 + $0x120] sm:$0xff]  ;;  %1748 = vmatpush1.bf16.msra.mxu1 %v2586_v37  ;;  %v2598_v48 = vpack.c.bf16 %v85_v41, %v81_v40  ;;  %v90_v49 = vld [vmem:[#allocation5 + $0xd8] sm:$0xff]  ;;  %v108_v51 = vld [vmem:[#allocation5 + $0x168] sm:$0xff] }
  0x43   :  { %v94_v50 = vld [vmem:[#allocation5 + $0xf8] sm:$0xff]  ;;  %1750 = vmatprep.subr.bf16.mxu1 %v2592_v45  ;;  %v89_v53 = vld [vmem:[#allocation5 + $0xd0] sm:$0xff]  ;;  %v2604_v55 = vpack.c.bf16 %v99_v44, %v95_v43  ;;  %v2607_v58 = vpack.c.bf16 %v108_v51, %v104_v47  ;;  %v103_v59 = vld [vmem:[#allocation5 + $0x140] sm:$0xff] }
  0x44   :  { %1720 = vmatpush1.bf16.msra.mxu0 %v2577_v26  ;;  %v2601_v52 = vpack.c.bf16 %v94_v50, %v90_v49  ;;  %v93_v54 = vld [vmem:[#allocation5 + $0xf0] sm:$0xff]  ;;  %v98_v56 = vld [vmem:[#allocation5 + $0x118] sm:$0xff]  ;;  %v107_v60 = vld [vmem:[#allocation5 + $0x160] sm:$0xff] }
  0x45   :  { %1722 = vmatprep.subr.bf16.mxu0 %v2581_v30  ;;  %v102_v57 = vld [vmem:[#allocation5 + $0x138] sm:$0xff]  ;;  %v112_v61 = vld [vmem:[#allocation5 + $0x188] sm:$0xff]  ;;  %v2610_v62 = vpack.c.bf16 %v93_v54, %v89_v53  ;;  %v97_v2 = vld [vmem:[#allocation5 + $0x110] sm:$0xff]  ;;  %v2616_v7 = vpack.c.bf16 %v107_v60, %v103_v59 }
  0x46   :  { %1752 = vmatpush1.bf16.msra.mxu1 %v2598_v48  ;;  %v116_v63 = vld [vmem:[#allocation5 + $0x1a8] sm:$0xff]  ;;  %v2613_v1 = vpack.c.bf16 %v102_v57, %v98_v56  ;;  %v101_v3 = vld [vmem:[#allocation5 + $0x130] sm:$0xff]  ;;  %v106_v5 = vld [vmem:[#allocation5 + $0x158] sm:$0xff] }
  0x47   :  { %1754 = vmatprep.subr.bf16.mxu1 %v2601_v52  ;;  %v110_v6 = vld [vmem:[#allocation5 + $0x178] sm:$0xff]  ;;  %v2619_v10 = vpack.c.bf16 %v116_v63, %v112_v61  ;;  %v111_v11 = vld [vmem:[#allocation5 + $0x180] sm:$0xff]  ;;  %v120_v13 = vld [vmem:[#allocation5 + $0x1c8] sm:$0xff]  ;;  %v2622_v15 = vpack.c.bf16 %v101_v3, %v97_v2 }
  0x48   :  { %1724 = vmatpush1.bf16.msra.mxu0 %v2590_v42  ;;  %v115_v12 = vld [vmem:[#allocation5 + $0x1a0] sm:$0xff]  ;;  %v124_v16 = vld [vmem:[#allocation5 + $0x1e8] sm:$0xff]  ;;  %v2625_v18 = vpack.c.bf16 %v110_v6, %v106_v5  ;;  %v105_v19 = vld [vmem:[#allocation5 + $0x150] sm:$0xff] }
  0x49   :  { %1726 = vmatprep.subr.bf16.mxu0 %v2595_v46  ;;  %v109_v20 = vld [vmem:[#allocation5 + $0x170] sm:$0xff]  ;;  %v114_v21 = vld [vmem:[#allocation5 + $0x198] sm:$0xff]  ;;  %v2628_v24 = vpack.c.bf16 %v115_v12, %v111_v11  ;;  %v2631_v27 = vpack.c.bf16 %v124_v16, %v120_v13  ;;  %v119_v28 = vld [vmem:[#allocation5 + $0x1c0] sm:$0xff] }
  0x4a   :  { %1756 = vmatpush1.bf16.msra.mxu1 %v2610_v62  ;;  %v118_v23 = vld [vmem:[#allocation5 + $0x1b8] sm:$0xff]  ;;  %v123_v29 = vld [vmem:[#allocation5 + $0x1e0] sm:$0xff]  ;;  %v2634_v31 = vpack.c.bf16 %v109_v20, %v105_v19  ;;  %v113_v34 = vld [vmem:[#allocation5 + $0x190] sm:$0xff] }
  0x4b   :  { %1758 = vmatprep.subr.bf16.mxu1 %v2613_v1  ;;  %v2637_v32 = vpack.c.bf16 %v118_v23, %v114_v21  ;;  %v117_v35 = vld [vmem:[#allocation5 + $0x1b0] sm:$0xff]  ;;  %v122_v36 = vld [vmem:[#allocation5 + $0x1d8] sm:$0xff]  ;;  %v2640_v39 = vpack.c.bf16 %v123_v29, %v119_v28  ;;  %v59_v49 = vld [vmem:[#allocation2] sm:$0xff] }
  0x4c   :  { %1728 = vmatpush1.bf16.msra.mxu0 %v2604_v55  ;;  %v126_v38 = vld [vmem:[#allocation5 + $0x1f8] sm:$0xff]  ;;  %v2644_v40 = vpack.c.bf16 %v117_v35, %v113_v34  ;;  %v121_v43 = vld [vmem:[#allocation5 + $0x1d0] sm:$0xff]  ;;  %v60_v50 = vld [vmem:[#allocation2 + $0x8] sm:$0xff] }
  0x4d   :  { %1730 = vmatprep.subr.bf16.mxu0 %v2607_v58  ;;  %v2647_v41 = vpack.c.bf16 %v126_v38, %v122_v36  ;;  %v125_v44 = vld [vmem:[#allocation5 + $0x1f0] sm:$0xff]  ;;  %v62_v60 = vld [vmem:[#allocation2 + $0x18] sm:$0xff] }
  0x4e   :  { %1760 = vmatpush1.bf16.msra.mxu1 %v2622_v15  ;;  %v2651_v47 = vpack.c.bf16 %v125_v44, %v121_v43  ;;  %v61_v3 = vld [vmem:[#allocation2 + $0x10] sm:$0xff]  ;;  %v298_v44 = vld [vmem:[#allocation2 + $0x20] sm:$0xff] }
  0x4f   :  { %1762 = vmatprep.subr.bf16.mxu1 %v2625_v18 }
  0x50   :  { %1732 = vmatpush1.bf16.msra.mxu0 %v2616_v7 }
  0x51   :  { %1734 = vmatprep.subr.bf16.mxu0 %v2619_v10 }
  0x52   :  { %1764 = vmatpush1.bf16.msra.mxu1 %v2634_v31 }
  0x53   :  { %1766 = vmatprep.subr.bf16.mxu1 %v2637_v32 }
  0x54   :  { %1736 = vmatpush1.bf16.msra.mxu0 %v2628_v24 }
  0x55   :  { %1738 = vmatprep.subr.bf16.mxu0 %v2631_v27 }
  0x56   :  { %1768 = vmatpush1.bf16.msra.mxu1 %v2644_v40 }
  0x57   :  { %1770 = vmatprep.subr.bf16.mxu1 %v2647_v41 }
  0x58   :  { %1740 = vmatpush1.bf16.msra.mxu0 %v2640_v39 }
  0x59   :  { %1774 = vmatprep.subr.bf16.mxu0 %v2559_v4 }
  0x5a   :  { %1772 = vmatpush1.bf16.msra.mxu1 %v2651_v47 }
  0x5b   :  { %192 = vmatmul.mubr.f32.vlgmr.msra.gmra.mrb[0].mxu0 %v2485_v0  ;;  %1806 = vmatprep.subr.bf16.mxu1 %v2572_v22 }
  0x5c   :  { %1776 = vmatpush1.bf16.msra.mxu0 %v2561_v8  ;;  %366 = vmatprep.mubr.f32.mxu0 %v2485_v0 }
  0x5d   :  { %1778 = vmatprep.subr.bf16.mxu0 %v2563_v9  ;;  %263 = vmatmul.mubr.f32.vlgmr.msra.gmra.mrb[0].mxu1 %v2485_v0 }
  0x5e   :  { %1808 = vmatpush1.bf16.msra.mxu1 %v2574_v25  ;;  %437 = vmatprep.mubr.f32.mxu1 %v2485_v0 }
  0x5f   :  { %1810 = vmatprep.subr.bf16.mxu1 %v2584_v33 }
  0x60   :  { %1780 = vmatpush1.bf16.msra.mxu0 %v2567_v14 }
  0x61   :  { %1782 = vmatprep.subr.bf16.mxu0 %v2570_v17 }
  0x62   :  { %1812 = vmatpush1.bf16.msra.mxu1 %v2586_v37 }
  0x63   :  { %1814 = vmatprep.subr.bf16.mxu1 %v2592_v45 }
  0x64   :  { %1784 = vmatpush1.bf16.msra.mxu0 %v2577_v26 }
  0x65   :  { %1786 = vmatprep.subr.bf16.mxu0 %v2581_v30 }
  0x66   :  { %1816 = vmatpush1.bf16.msra.mxu1 %v2598_v48 }
  0x67   :  { %1818 = vmatprep.subr.bf16.mxu1 %v2601_v52 }
  0x68   :  { %1788 = vmatpush1.bf16.msra.mxu0 %v2590_v42 }
  0x69   :  { %1790 = vmatprep.subr.bf16.mxu0 %v2595_v46 }
  0x6a   :  { %1820 = vmatpush1.bf16.msra.mxu1 %v2610_v62 }
  0x6b   :  { %1822 = vmatprep.subr.bf16.mxu1 %v2613_v1 }
  0x6c   :  { %1792 = vmatpush1.bf16.msra.mxu0 %v2604_v55 }
  0x6d   :  { %1794 = vmatprep.subr.bf16.mxu0 %v2607_v58 }
  0x6e   :  { %1824 = vmatpush1.bf16.msra.mxu1 %v2622_v15 }
  0x6f   :  { %1826 = vmatprep.subr.bf16.mxu1 %v2625_v18 }
  0x70   :  { %1796 = vmatpush1.bf16.msra.mxu0 %v2616_v7 }
  0x71   :  { %1798 = vmatprep.subr.bf16.mxu0 %v2619_v10 }
  0x72   :  { %1828 = vmatpush1.bf16.msra.mxu1 %v2634_v31 }
  0x73   :  { %1830 = vmatprep.subr.bf16.mxu1 %v2637_v32 }
  0x74   :  { %1800 = vmatpush1.bf16.msra.mxu0 %v2628_v24 }
  0x75   :  { %1802 = vmatprep.subr.bf16.mxu0 %v2631_v27 }
  0x76   :  { %1832 = vmatpush1.bf16.msra.mxu1 %v2644_v40 }
  0x77   :  { %1834 = vmatprep.subr.bf16.mxu1 %v2647_v41 }
  0x78   :  { %1804 = vmatpush1.bf16.msra.mxu0 %v2640_v39 }
  0x79   :  { %1838 = vmatprep.subr.bf16.mxu0 %v2559_v4 }
  0x7a   :  { %1836 = vmatpush1.bf16.msra.mxu1 %v2651_v47 }
  0x7b   :  { %1870 = vmatprep.subr.bf16.mxu1 %v2572_v22 }
 0x12e   :  { %v193_v51 = vpop.f32.mrb[0].mxu0 }
 0x12f   :  { %v269_v53 = vadd.f32 %v193_v51, %v59_v49  ;;  %v195_v54 = vpop.f32.mrb[1].mxu0  ;;  %v299_v49 = vld [vmem:[#allocation2 + $0x28] sm:$0xff] }
 0x130   :  { %v270_v56 = vadd.f32 %v195_v54, %v60_v50  ;;  %v264_v61 = vpop.f32.mrb[0].mxu1 }
 0x131   :  { %v1632_v57 = vmul.f32 -1.442695, %v269_v53  ;;  %v266_v63 = vpop.f32.mrb[1].mxu1  ;;  %v271_v6 = vadd.f32 %v264_v61, %v61_v3  ;;  %v301_v61 = vld [vmem:[#allocation2 + $0x38] sm:$0xff] }
 0x132   :  { %v1633_v59 = vmul.f32 -1.442695, %v270_v56  ;;  %v272_v2 = vadd.f32 %v266_v63, %v62_v60 }
 0x133   :  { %2256 = vpow2.f32 %v1632_v57 }
 0x134   :  { %2258 = vpow2.f32 %v1633_v59  ;;  %v1634_v5 = vmul.f32 -1.442695, %v272_v2  ;;  %v300_v2 = vld [vmem:[#allocation2 + $0x30] sm:$0xff] }
 0x136   :  { %2260 = vpow2.f32 %v1634_v5 }
 0x137   :  { %2262 = vtanh.f32 %v271_v6 }
 0x13d   :  { %v2257_v11 = vpop.eup %2256 }
 0x13e   :  { %v2259_v12 = vpop.eup %2258  ;;  %v276_v13 = vadd.f32 1.0, %v2257_v11 }
 0x13f   :  { %v282_v16 = vadd.f32 1.0, %v2259_v12 }
 0x140   :  { %2264 = vrcp.f32 %v276_v13  ;;  %v2261_v19 = vpop.eup %2260 }
 0x141   :  { %2266 = vrcp.f32 %v282_v16  ;;  %v2263_v20 = vpop.eup %2262  ;;  %v289_v23 = vadd.f32 1.0, %v2261_v19 }
 0x143   :  { %2268 = vrcp.f32 %v289_v23 }
 0x14a   :  { %v2265_v21 = vpop.eup %2264 }
 0x14b   :  { %v2267_v28 = vpop.eup %2266  ;;  %v293_v29 = vmul.f32 %v2265_v21, %v2263_v20 }
 0x14c   :  { %v292_v34 = vmul.f32 0.0, %v2267_v28 }
 0x14d   :  { %v2269_v36 = vpop.eup %2268 }
 0x14e   :  { %v2693_v35 = vadd.f32 %v293_v29, %v292_v34 }
 0x150   :  { %2270 = vtanh.f32 %v2693_v35 }
 0x15a   :  { %v2271_v38 = vpop.eup %2270 }
 0x15b   :  { %v296_v43 = vmul.f32 %v2271_v38, %v2269_v36 }
 0x15d   :  { %367 = vmatmul.mubr.f32.vlgmr.msra.gmra.mrb[2].mxu0 %v296_v43  ;;  %438 = vmatmul.mubr.f32.vlgmr.msra.gmra.mrb[2].mxu1 %v296_v43 }
 0x15e   :  { %1840 = vmatpush1.bf16.msra.mxu0 %v2561_v8  ;;  %1872 = vmatpush1.bf16.msra.mxu1 %v2574_v25 }
 0x15f   :  { %1842 = vmatprep.subr.bf16.mxu0 %v2563_v9  ;;  %1874 = vmatprep.subr.bf16.mxu1 %v2584_v33 }
 0x160   :  { %541 = vmatprep.mubr.f32.mxu0 %v2485_v0  ;;  %612 = vmatprep.mubr.f32.mxu1 %v2485_v0 }
 0x162   :  { %1844 = vmatpush1.bf16.msra.mxu0 %v2567_v14  ;;  %1876 = vmatpush1.bf16.msra.mxu1 %v2586_v37 }
 0x163   :  { %1846 = vmatprep.subr.bf16.mxu0 %v2570_v17  ;;  %1878 = vmatprep.subr.bf16.mxu1 %v2592_v45 }
 0x166   :  { %1848 = vmatpush1.bf16.msra.mxu0 %v2577_v26  ;;  %1880 = vmatpush1.bf16.msra.mxu1 %v2598_v48 }
 0x167   :  { %1850 = vmatprep.subr.bf16.mxu0 %v2581_v30  ;;  %1882 = vmatprep.subr.bf16.mxu1 %v2601_v52 }
 0x16a   :  { %1852 = vmatpush1.bf16.msra.mxu0 %v2590_v42  ;;  %1884 = vmatpush1.bf16.msra.mxu1 %v2610_v62 }
 0x16b   :  { %1854 = vmatprep.subr.bf16.mxu0 %v2595_v46  ;;  %1886 = vmatprep.subr.bf16.mxu1 %v2613_v1 }
 0x16e   :  { %1856 = vmatpush1.bf16.msra.mxu0 %v2604_v55  ;;  %1888 = vmatpush1.bf16.msra.mxu1 %v2622_v15 }
 0x16f   :  { %1858 = vmatprep.subr.bf16.mxu0 %v2607_v58  ;;  %1890 = vmatprep.subr.bf16.mxu1 %v2625_v18 }
 0x172   :  { %1860 = vmatpush1.bf16.msra.mxu0 %v2616_v7  ;;  %1892 = vmatpush1.bf16.msra.mxu1 %v2634_v31 }
 0x173   :  { %1862 = vmatprep.subr.bf16.mxu0 %v2619_v10  ;;  %1894 = vmatprep.subr.bf16.mxu1 %v2637_v32 }
 0x176   :  { %1864 = vmatpush1.bf16.msra.mxu0 %v2628_v24  ;;  %1896 = vmatpush1.bf16.msra.mxu1 %v2644_v40 }
 0x177   :  { %1866 = vmatprep.subr.bf16.mxu0 %v2631_v27  ;;  %1898 = vmatprep.subr.bf16.mxu1 %v2647_v41 }
 0x17a   :  { %1868 = vmatpush1.bf16.msra.mxu0 %v2640_v39  ;;  %1900 = vmatpush1.bf16.msra.mxu1 %v2651_v47 }
 0x17b   :  { %1902 = vmatprep.subr.bf16.mxu0 %v2559_v4  ;;  %1934 = vmatprep.subr.bf16.mxu1 %v2572_v22 }
 0x230   :  { %v368_v50 = vpop.f32.mrb[2].mxu0  ;;  %v439_v51 = vpop.f32.mrb[2].mxu1 }
 0x231   :  { %v444_v53 = vadd.f32 %v368_v50, %v298_v44  ;;  %v370_v54 = vpop.f32.mrb[3].mxu0  ;;  %v441_v56 = vpop.f32.mrb[3].mxu1  ;;  %v446_v5 = vadd.f32 %v439_v51, %v300_v2  ;;  %v474_v44 = vld [vmem:[#allocation2 + $0x48] sm:$0xff] }
 0x232   :  { %v445_v57 = vadd.f32 %v370_v54, %v299_v49  ;;  %v447_v63 = vadd.f32 %v441_v56, %v301_v61 }
 0x233   :  { %v1635_v59 = vmul.f32 -1.442695, %v444_v53 }
 0x234   :  { %v1636_v60 = vmul.f32 -1.442695, %v445_v57  ;;  %v1637_v3 = vmul.f32 -1.442695, %v447_v63  ;;  %v475_v63 = vld [vmem:[#allocation2 + $0x50] sm:$0xff] }
 0x235   :  { %2272 = vpow2.f32 %v1635_v59 }
 0x236   :  { %2274 = vpow2.f32 %v1636_v60  ;;  %v476_v60 = vld [vmem:[#allocation2 + $0x58] sm:$0xff] }
 0x237   :  { %2276 = vpow2.f32 %v1637_v3 }
 0x238   :  { %2278 = vtanh.f32 %v446_v5 }
 0x23f   :  { %v2273_v6 = vpop.eup %2272 }
 0x240   :  { %v2275_v11 = vpop.eup %2274  ;;  %v451_v12 = vadd.f32 1.0, %v2273_v6 }
 0x241   :  { %v457_v13 = vadd.f32 1.0, %v2275_v11  ;;  %v2277_v16 = vpop.eup %2276 }
 0x242   :  { %2280 = vrcp.f32 %v451_v12  ;;  %v2279_v19 = vpop.eup %2278  ;;  %v464_v28 = vadd.f32 1.0, %v2277_v16 }
 0x243   :  { %2282 = vrcp.f32 %v457_v13 }
 0x244   :  { %2284 = vrcp.f32 %v464_v28 }
 0x24c   :  { %v2281_v20 = vpop.eup %2280 }
 0x24d   :  { %v2283_v21 = vpop.eup %2282  ;;  %v468_v23 = vmul.f32 %v2281_v20, %v2279_v19 }
 0x24e   :  { %v467_v29 = vmul.f32 %v2283_v21, %v2693_v35  ;;  %v2285_v36 = vpop.eup %2284  ;;  %v473_v35 = vld [vmem:[#allocation2 + $0x40] sm:$0xff] }
 0x250   :  { %v2731_v34 = vadd.f32 %v468_v23, %v467_v29 }
 0x252   :  { %2286 = vtanh.f32 %v2731_v34 }
 0x25c   :  { %v2287_v38 = vpop.eup %2286 }
 0x25d   :  { %v471_v43 = vmul.f32 %v2287_v38, %v2285_v36 }
 0x25f   :  { %542 = vmatmul.mubr.f32.vlgmr.msra.gmra.mrb[4].mxu0 %v471_v43  ;;  %613 = vmatmul.mubr.f32.vlgmr.msra.gmra.mrb[4].mxu1 %v471_v43 }
 0x260   :  { %1904 = vmatpush1.bf16.msra.mxu0 %v2561_v8  ;;  %1936 = vmatpush1.bf16.msra.mxu1 %v2574_v25 }
 0x261   :  { %1906 = vmatprep.subr.bf16.mxu0 %v2563_v9  ;;  %1938 = vmatprep.subr.bf16.mxu1 %v2584_v33 }
 0x262   :  { %716 = vmatprep.mubr.f32.mxu0 %v2485_v0  ;;  %787 = vmatprep.mubr.f32.mxu1 %v2485_v0 }
 0x264   :  { %1908 = vmatpush1.bf16.msra.mxu0 %v2567_v14  ;;  %1940 = vmatpush1.bf16.msra.mxu1 %v2586_v37 }
 0x265   :  { %1910 = vmatprep.subr.bf16.mxu0 %v2570_v17  ;;  %1942 = vmatprep.subr.bf16.mxu1 %v2592_v45 }
 0x268   :  { %1912 = vmatpush1.bf16.msra.mxu0 %v2577_v26  ;;  %1944 = vmatpush1.bf16.msra.mxu1 %v2598_v48 }
 0x269   :  { %1914 = vmatprep.subr.bf16.mxu0 %v2581_v30  ;;  %1946 = vmatprep.subr.bf16.mxu1 %v2601_v52 }
 0x26c   :  { %1916 = vmatpush1.bf16.msra.mxu0 %v2590_v42  ;;  %1948 = vmatpush1.bf16.msra.mxu1 %v2610_v62 }
 0x26d   :  { %1918 = vmatprep.subr.bf16.mxu0 %v2595_v46  ;;  %1950 = vmatprep.subr.bf16.mxu1 %v2613_v1 }
 0x270   :  { %1920 = vmatpush1.bf16.msra.mxu0 %v2604_v55  ;;  %1952 = vmatpush1.bf16.msra.mxu1 %v2622_v15 }
 0x271   :  { %1922 = vmatprep.subr.bf16.mxu0 %v2607_v58  ;;  %1954 = vmatprep.subr.bf16.mxu1 %v2625_v18 }
 0x274   :  { %1924 = vmatpush1.bf16.msra.mxu0 %v2616_v7  ;;  %1956 = vmatpush1.bf16.msra.mxu1 %v2634_v31 }
 0x275   :  { %1926 = vmatprep.subr.bf16.mxu0 %v2619_v10  ;;  %1958 = vmatprep.subr.bf16.mxu1 %v2637_v32 }
 0x278   :  { %1928 = vmatpush1.bf16.msra.mxu0 %v2628_v24  ;;  %1960 = vmatpush1.bf16.msra.mxu1 %v2644_v40 }
 0x279   :  { %1930 = vmatprep.subr.bf16.mxu0 %v2631_v27  ;;  %1962 = vmatprep.subr.bf16.mxu1 %v2647_v41 }
 0x27c   :  { %1932 = vmatpush1.bf16.msra.mxu0 %v2640_v39  ;;  %1964 = vmatpush1.bf16.msra.mxu1 %v2651_v47 }
 0x27d   :  { %1966 = vmatprep.subr.bf16.mxu0 %v2559_v4  ;;  %1998 = vmatprep.subr.bf16.mxu1 %v2572_v22 }
 0x332   :  { %v543_v49 = vpop.f32.mrb[4].mxu0  ;;  %v614_v50 = vpop.f32.mrb[4].mxu1 }
 0x333   :  { %v619_v51 = vadd.f32 %v543_v49, %v473_v35  ;;  %v545_v53 = vpop.f32.mrb[5].mxu0  ;;  %v616_v54 = vpop.f32.mrb[5].mxu1  ;;  %v621_v3 = vadd.f32 %v614_v50, %v475_v63  ;;  %v649_v35 = vld [vmem:[#allocation2 + $0x68] sm:$0xff] }
 0x334   :  { %v620_v56 = vadd.f32 %v545_v53, %v474_v44  ;;  %v622_v61 = vadd.f32 %v616_v54, %v476_v60 }
 0x335   :  { %v1638_v57 = vmul.f32 -1.442695, %v619_v51 }
 0x336   :  { %v1639_v59 = vmul.f32 -1.442695, %v620_v56  ;;  %v1640_v2 = vmul.f32 -1.442695, %v622_v61  ;;  %v650_v61 = vld [vmem:[#allocation2 + $0x70] sm:$0xff] }
 0x337   :  { %2288 = vpow2.f32 %v1638_v57 }
 0x338   :  { %2290 = vpow2.f32 %v1639_v59  ;;  %v651_v59 = vld [vmem:[#allocation2 + $0x78] sm:$0xff] }
 0x339   :  { %2292 = vpow2.f32 %v1640_v2 }
 0x33a   :  { %2294 = vtanh.f32 %v621_v3 }
 0x341   :  { %v2289_v5 = vpop.eup %2288 }
 0x342   :  { %v2291_v6 = vpop.eup %2290  ;;  %v626_v11 = vadd.f32 1.0, %v2289_v5 }
 0x343   :  { %v632_v12 = vadd.f32 1.0, %v2291_v6  ;;  %v2293_v13 = vpop.eup %2292 }
 0x344   :  { %2296 = vrcp.f32 %v626_v11  ;;  %v2295_v16 = vpop.eup %2294  ;;  %v639_v23 = vadd.f32 1.0, %v2293_v13 }
 0x345   :  { %2298 = vrcp.f32 %v632_v12 }
 0x346   :  { %2300 = vrcp.f32 %v639_v23 }
 0x34e   :  { %v2297_v19 = vpop.eup %2296 }
 0x34f   :  { %v2299_v20 = vpop.eup %2298  ;;  %v643_v21 = vmul.f32 %v2297_v19, %v2295_v16 }
 0x350   :  { %v642_v28 = vmul.f32 %v2299_v20, %v2731_v34  ;;  %v2301_v36 = vpop.eup %2300  ;;  %v648_v34 = vld [vmem:[#allocation2 + $0x60] sm:$0xff] }
 0x352   :  { %v2769_v29 = vadd.f32 %v643_v21, %v642_v28 }
 0x354   :  { %2302 = vtanh.f32 %v2769_v29 }
 0x35e   :  { %v2303_v38 = vpop.eup %2302 }
 0x35f   :  { %v646_v43 = vmul.f32 %v2303_v38, %v2301_v36 }
 0x361   :  { %717 = vmatmul.mubr.f32.vlgmr.msra.gmra.mrb[6].mxu0 %v646_v43  ;;  %788 = vmatmul.mubr.f32.vlgmr.msra.gmra.mrb[6].mxu1 %v646_v43 }
 0x362   :  { %1968 = vmatpush1.bf16.msra.mxu0 %v2561_v8  ;;  %2000 = vmatpush1.bf16.msra.mxu1 %v2574_v25 }
 0x363   :  { %1970 = vmatprep.subr.bf16.mxu0 %v2563_v9  ;;  %2002 = vmatprep.subr.bf16.mxu1 %v2584_v33 }
 0x364   :  { %891 = vmatprep.mubr.f32.mxu0 %v2485_v0  ;;  %962 = vmatprep.mubr.f32.mxu1 %v2485_v0 }
 0x366   :  { %1972 = vmatpush1.bf16.msra.mxu0 %v2567_v14  ;;  %2004 = vmatpush1.bf16.msra.mxu1 %v2586_v37 }
 0x367   :  { %1974 = vmatprep.subr.bf16.mxu0 %v2570_v17  ;;  %2006 = vmatprep.subr.bf16.mxu1 %v2592_v45 }
 0x36a   :  { %1976 = vmatpush1.bf16.msra.mxu0 %v2577_v26  ;;  %2008 = vmatpush1.bf16.msra.mxu1 %v2598_v48 }
 0x36b   :  { %1978 = vmatprep.subr.bf16.mxu0 %v2581_v30  ;;  %2010 = vmatprep.subr.bf16.mxu1 %v2601_v52 }
 0x36e   :  { %1980 = vmatpush1.bf16.msra.mxu0 %v2590_v42  ;;  %2012 = vmatpush1.bf16.msra.mxu1 %v2610_v62 }
 0x36f   :  { %1982 = vmatprep.subr.bf16.mxu0 %v2595_v46  ;;  %2014 = vmatprep.subr.bf16.mxu1 %v2613_v1 }
 0x372   :  { %1984 = vmatpush1.bf16.msra.mxu0 %v2604_v55  ;;  %2016 = vmatpush1.bf16.msra.mxu1 %v2622_v15 }
 0x373   :  { %1986 = vmatprep.subr.bf16.mxu0 %v2607_v58  ;;  %2018 = vmatprep.subr.bf16.mxu1 %v2625_v18 }
 0x376   :  { %1988 = vmatpush1.bf16.msra.mxu0 %v2616_v7  ;;  %2020 = vmatpush1.bf16.msra.mxu1 %v2634_v31 }
 0x377   :  { %1990 = vmatprep.subr.bf16.mxu0 %v2619_v10  ;;  %2022 = vmatprep.subr.bf16.mxu1 %v2637_v32 }
 0x37a   :  { %1992 = vmatpush1.bf16.msra.mxu0 %v2628_v24  ;;  %2024 = vmatpush1.bf16.msra.mxu1 %v2644_v40 }
 0x37b   :  { %1994 = vmatprep.subr.bf16.mxu0 %v2631_v27  ;;  %2026 = vmatprep.subr.bf16.mxu1 %v2647_v41 }
 0x37e   :  { %1996 = vmatpush1.bf16.msra.mxu0 %v2640_v39  ;;  %2028 = vmatpush1.bf16.msra.mxu1 %v2651_v47 }
 0x37f   :  { %2030 = vmatprep.subr.bf16.mxu0 %v2559_v4  ;;  %2062 = vmatprep.subr.bf16.mxu1 %v2572_v22 }
 0x434   :  { %v718_v44 = vpop.f32.mrb[6].mxu0  ;;  %v789_v49 = vpop.f32.mrb[6].mxu1 }
 0x435   :  { %v794_v50 = vadd.f32 %v718_v44, %v648_v34  ;;  %v720_v51 = vpop.f32.mrb[7].mxu0  ;;  %v791_v53 = vpop.f32.mrb[7].mxu1  ;;  %v796_v2 = vadd.f32 %v789_v49, %v650_v61  ;;  %v824_v34 = vld [vmem:[#allocation2 + $0x88] sm:$0xff] }
 0x436   :  { %v795_v54 = vadd.f32 %v720_v51, %v649_v35  ;;  %v797_v60 = vadd.f32 %v791_v53, %v651_v59 }
 0x437   :  { %v1641_v56 = vmul.f32 -1.442695, %v794_v50 }
 0x438   :  { %v1642_v57 = vmul.f32 -1.442695, %v795_v54  ;;  %v1643_v63 = vmul.f32 -1.442695, %v797_v60  ;;  %v825_v60 = vld [vmem:[#allocation2 + $0x90] sm:$0xff] }
 0x439   :  { %2304 = vpow2.f32 %v1641_v56 }
 0x43a   :  { %2306 = vpow2.f32 %v1642_v57  ;;  %v826_v57 = vld [vmem:[#allocation2 + $0x98] sm:$0xff] }
 0x43b   :  { %2308 = vpow2.f32 %v1643_v63 }
 0x43c   :  { %2310 = vtanh.f32 %v796_v2 }
 0x443   :  { %v2305_v3 = vpop.eup %2304 }
 0x444   :  { %v2307_v5 = vpop.eup %2306  ;;  %v801_v6 = vadd.f32 1.0, %v2305_v3 }
 0x445   :  { %v807_v11 = vadd.f32 1.0, %v2307_v5  ;;  %v2309_v12 = vpop.eup %2308 }
 0x446   :  { %2312 = vrcp.f32 %v801_v6  ;;  %v2311_v13 = vpop.eup %2310  ;;  %v814_v21 = vadd.f32 1.0, %v2309_v12 }
 0x447   :  { %2314 = vrcp.f32 %v807_v11 }
 0x448   :  { %2316 = vrcp.f32 %v814_v21 }
 0x450   :  { %v2313_v16 = vpop.eup %2312 }
 0x451   :  { %v2315_v19 = vpop.eup %2314  ;;  %v818_v20 = vmul.f32 %v2313_v16, %v2311_v13 }
 0x452   :  { %v817_v23 = vmul.f32 %v2315_v19, %v2769_v29  ;;  %v2317_v36 = vpop.eup %2316  ;;  %v823_v29 = vld [vmem:[#allocation2 + $0x80] sm:$0xff] }
 0x454   :  { %v2807_v28 = vadd.f32 %v818_v20, %v817_v23 }
 0x456   :  { %2318 = vtanh.f32 %v2807_v28 }
 0x460   :  { %v2319_v38 = vpop.eup %2318 }
 0x461   :  { %v821_v43 = vmul.f32 %v2319_v38, %v2317_v36 }
 0x463   :  { %892 = vmatmul.mubr.f32.vlgmr.msra.gmra.mrb[8].mxu0 %v821_v43  ;;  %963 = vmatmul.mubr.f32.vlgmr.msra.gmra.mrb[8].mxu1 %v821_v43 }
 0x464   :  { %2032 = vmatpush1.bf16.msra.mxu0 %v2561_v8  ;;  %2064 = vmatpush1.bf16.msra.mxu1 %v2574_v25 }
 0x465   :  { %2034 = vmatprep.subr.bf16.mxu0 %v2563_v9  ;;  %2066 = vmatprep.subr.bf16.mxu1 %v2584_v33 }
 0x466   :  { %1066 = vmatprep.mubr.f32.mxu0 %v2485_v0  ;;  %1137 = vmatprep.mubr.f32.mxu1 %v2485_v0 }
 0x468   :  { %2036 = vmatpush1.bf16.msra.mxu0 %v2567_v14  ;;  %2068 = vmatpush1.bf16.msra.mxu1 %v2586_v37 }
 0x469   :  { %2038 = vmatprep.subr.bf16.mxu0 %v2570_v17  ;;  %2070 = vmatprep.subr.bf16.mxu1 %v2592_v45 }
 0x46c   :  { %2040 = vmatpush1.bf16.msra.mxu0 %v2577_v26  ;;  %2072 = vmatpush1.bf16.msra.mxu1 %v2598_v48 }
 0x46d   :  { %2042 = vmatprep.subr.bf16.mxu0 %v2581_v30  ;;  %2074 = vmatprep.subr.bf16.mxu1 %v2601_v52 }
 0x470   :  { %2044 = vmatpush1.bf16.msra.mxu0 %v2590_v42  ;;  %2076 = vmatpush1.bf16.msra.mxu1 %v2610_v62 }
 0x471   :  { %2046 = vmatprep.subr.bf16.mxu0 %v2595_v46  ;;  %2078 = vmatprep.subr.bf16.mxu1 %v2613_v1 }
 0x474   :  { %2048 = vmatpush1.bf16.msra.mxu0 %v2604_v55  ;;  %2080 = vmatpush1.bf16.msra.mxu1 %v2622_v15 }
 0x475   :  { %2050 = vmatprep.subr.bf16.mxu0 %v2607_v58  ;;  %2082 = vmatprep.subr.bf16.mxu1 %v2625_v18 }
 0x478   :  { %2052 = vmatpush1.bf16.msra.mxu0 %v2616_v7  ;;  %2084 = vmatpush1.bf16.msra.mxu1 %v2634_v31 }
 0x479   :  { %2054 = vmatprep.subr.bf16.mxu0 %v2619_v10  ;;  %2086 = vmatprep.subr.bf16.mxu1 %v2637_v32 }
 0x47c   :  { %2056 = vmatpush1.bf16.msra.mxu0 %v2628_v24  ;;  %2088 = vmatpush1.bf16.msra.mxu1 %v2644_v40 }
 0x47d   :  { %2058 = vmatprep.subr.bf16.mxu0 %v2631_v27  ;;  %2090 = vmatprep.subr.bf16.mxu1 %v2647_v41 }
 0x480   :  { %2060 = vmatpush1.bf16.msra.mxu0 %v2640_v39  ;;  %2092 = vmatpush1.bf16.msra.mxu1 %v2651_v47 }
 0x481   :  { %2094 = vmatprep.subr.bf16.mxu0 %v2559_v4  ;;  %2126 = vmatprep.subr.bf16.mxu1 %v2572_v22 }
 0x536   :  { %v893_v35 = vpop.f32.mrb[8].mxu0  ;;  %v964_v44 = vpop.f32.mrb[8].mxu1 }
 0x537   :  { %v969_v49 = vadd.f32 %v893_v35, %v823_v29  ;;  %v895_v50 = vpop.f32.mrb[9].mxu0  ;;  %v966_v51 = vpop.f32.mrb[9].mxu1  ;;  %v971_v63 = vadd.f32 %v964_v44, %v825_v60  ;;  %v999_v29 = vld [vmem:[#allocation2 + $0xa8] sm:$0xff] }
 0x538   :  { %v970_v53 = vadd.f32 %v895_v50, %v824_v34  ;;  %v972_v59 = vadd.f32 %v966_v51, %v826_v57 }
 0x539   :  { %v1644_v54 = vmul.f32 -1.442695, %v969_v49 }
 0x53a   :  { %v1645_v56 = vmul.f32 -1.442695, %v970_v53  ;;  %v1646_v61 = vmul.f32 -1.442695, %v972_v59  ;;  %v1000_v59 = vld [vmem:[#allocation2 + $0xb0] sm:$0xff] }
 0x53b   :  { %2320 = vpow2.f32 %v1644_v54 }
 0x53c   :  { %2322 = vpow2.f32 %v1645_v56  ;;  %v1001_v56 = vld [vmem:[#allocation2 + $0xb8] sm:$0xff] }
 0x53d   :  { %2324 = vpow2.f32 %v1646_v61 }
 0x53e   :  { %2326 = vtanh.f32 %v971_v63 }
 0x545   :  { %v2321_v2 = vpop.eup %2320 }
 0x546   :  { %v2323_v3 = vpop.eup %2322  ;;  %v976_v5 = vadd.f32 1.0, %v2321_v2 }
 0x547   :  { %v982_v6 = vadd.f32 1.0, %v2323_v3  ;;  %v2325_v11 = vpop.eup %2324 }
 0x548   :  { %2328 = vrcp.f32 %v976_v5  ;;  %v2327_v12 = vpop.eup %2326  ;;  %v989_v20 = vadd.f32 1.0, %v2325_v11 }
 0x549   :  { %2330 = vrcp.f32 %v982_v6 }
 0x54a   :  { %2332 = vrcp.f32 %v989_v20 }
 0x552   :  { %v2329_v13 = vpop.eup %2328 }
 0x553   :  { %v2331_v16 = vpop.eup %2330  ;;  %v993_v19 = vmul.f32 %v2329_v13, %v2327_v12 }
 0x554   :  { %v992_v21 = vmul.f32 %v2331_v16, %v2807_v28  ;;  %v2333_v36 = vpop.eup %2332  ;;  %v998_v28 = vld [vmem:[#allocation2 + $0xa0] sm:$0xff] }
 0x556   :  { %v2845_v23 = vadd.f32 %v993_v19, %v992_v21 }
 0x558   :  { %2334 = vtanh.f32 %v2845_v23 }
 0x562   :  { %v2335_v38 = vpop.eup %2334 }
 0x563   :  { %v996_v43 = vmul.f32 %v2335_v38, %v2333_v36  ;;  %v1523_v38 = vld [vmem:[#allocation7 + $0x8] sm:$0xff] }
 0x565   :  { %1067 = vmatmul.mubr.f32.vlgmr.msra.gmra.mrb[10].mxu0 %v996_v43  ;;  %1138 = vmatmul.mubr.f32.vlgmr.msra.gmra.mrb[10].mxu1 %v996_v43 }
 0x566   :  { %2096 = vmatpush1.bf16.msra.mxu0 %v2561_v8  ;;  %2128 = vmatpush1.bf16.msra.mxu1 %v2574_v25 }
 0x567   :  { %2098 = vmatprep.subr.bf16.mxu0 %v2563_v9  ;;  %2130 = vmatprep.subr.bf16.mxu1 %v2584_v33 }
 0x568   :  { %1241 = vmatprep.mubr.f32.mxu0 %v2485_v0  ;;  %1312 = vmatprep.mubr.f32.mxu1 %v2485_v0 }
 0x56a   :  { %2100 = vmatpush1.bf16.msra.mxu0 %v2567_v14  ;;  %2132 = vmatpush1.bf16.msra.mxu1 %v2586_v37 }
 0x56b   :  { %2102 = vmatprep.subr.bf16.mxu0 %v2570_v17  ;;  %2134 = vmatprep.subr.bf16.mxu1 %v2592_v45 }
 0x56e   :  { %2104 = vmatpush1.bf16.msra.mxu0 %v2577_v26  ;;  %2136 = vmatpush1.bf16.msra.mxu1 %v2598_v48 }
 0x56f   :  { %2106 = vmatprep.subr.bf16.mxu0 %v2581_v30  ;;  %2138 = vmatprep.subr.bf16.mxu1 %v2601_v52 }
 0x572   :  { %2108 = vmatpush1.bf16.msra.mxu0 %v2590_v42  ;;  %2140 = vmatpush1.bf16.msra.mxu1 %v2610_v62 }
 0x573   :  { %2110 = vmatprep.subr.bf16.mxu0 %v2595_v46  ;;  %2142 = vmatprep.subr.bf16.mxu1 %v2613_v1 }
 0x576   :  { %2112 = vmatpush1.bf16.msra.mxu0 %v2604_v55  ;;  %2144 = vmatpush1.bf16.msra.mxu1 %v2622_v15 }
 0x577   :  { %2114 = vmatprep.subr.bf16.mxu0 %v2607_v58  ;;  %2146 = vmatprep.subr.bf16.mxu1 %v2625_v18 }
 0x57a   :  { %2116 = vmatpush1.bf16.msra.mxu0 %v2616_v7  ;;  %2148 = vmatpush1.bf16.msra.mxu1 %v2634_v31 }
 0x57b   :  { %2118 = vmatprep.subr.bf16.mxu0 %v2619_v10  ;;  %2150 = vmatprep.subr.bf16.mxu1 %v2637_v32 }
 0x57e   :  { %2120 = vmatpush1.bf16.msra.mxu0 %v2628_v24  ;;  %2152 = vmatpush1.bf16.msra.mxu1 %v2644_v40 }
 0x57f   :  { %2122 = vmatprep.subr.bf16.mxu0 %v2631_v27  ;;  %2154 = vmatprep.subr.bf16.mxu1 %v2647_v41 }
 0x582   :  { %2124 = vmatpush1.bf16.msra.mxu0 %v2640_v39  ;;  %2156 = vmatpush1.bf16.msra.mxu1 %v2651_v47 }
 0x583   :  { %2158 = vmatprep.subr.bf16.mxu0 %v2559_v4  ;;  %2190 = vmatprep.subr.bf16.mxu1 %v2572_v22 }
 0x638   :  { %v1068_v34 = vpop.f32.mrb[10].mxu0  ;;  %v1139_v35 = vpop.f32.mrb[10].mxu1 }
 0x639   :  { %v1144_v44 = vadd.f32 %v1068_v34, %v998_v28  ;;  %v1070_v49 = vpop.f32.mrb[11].mxu0  ;;  %v1141_v50 = vpop.f32.mrb[11].mxu1  ;;  %v1146_v61 = vadd.f32 %v1139_v35, %v1000_v59  ;;  %v2486_v28 = vmov 0.0|0.0   ;;  %v1525_v34 = vld [vmem:[#allocation7 + $0x18] sm:$0xff] }
 0x63a   :  { %v1145_v51 = vadd.f32 %v1070_v49, %v999_v29  ;;  %v1147_v57 = vadd.f32 %v1141_v50, %v1001_v56  ;;  %v1524_v29 = vld [vmem:[#allocation7 + $0x10] sm:$0xff]  ;;  %v1527_v49 = vld [vmem:[#allocation7 + $0x28] sm:$0xff]  ;;  %v1530_v56 = vld [vmem:[#allocation7 + $0x40] sm:$0xff] }
 0x63b   :  { %v1647_v53 = vmul.f32 -1.442695, %v1144_v44  ;;  %v2225_v35 = vpack.c.bf16 %v1525_v34, %v1524_v29  ;;  %v1526_v44 = vld [vmem:[#allocation7 + $0x20] sm:$0xff] }
 0x63c   :  { %v1648_v54 = vmul.f32 -1.442695, %v1145_v51  ;;  %v1649_v60 = vmul.f32 -1.442695, %v1147_v57  ;;  %v2228_v50 = vpack.c.bf16 %v1527_v49, %v1526_v44  ;;  %v1528_v51 = vld [vmem:[#allocation7 + $0x30] sm:$0xff]  ;;  %v1531_v57 = vld [vmem:[#allocation7 + $0x48] sm:$0xff] }
 0x63d   :  { %2336 = vpow2.f32 %v1647_v53  ;;  %v1529_v53 = vld [vmem:[#allocation7 + $0x38] sm:$0xff]  ;;  %v2234_v59 = vpack.c.bf16 %v1531_v57, %v1530_v56 }
 0x63e   :  { %2338 = vpow2.f32 %v1648_v54  ;;  %v2231_v54 = vpack.c.bf16 %v1529_v53, %v1528_v51 }
 0x63f   :  { %2340 = vpow2.f32 %v1649_v60  ;;  %v1532_v60 = vld [vmem:[#allocation7 + $0x50] sm:$0xff] }
 0x640   :  { %2342 = vtanh.f32 %v1146_v61  ;;  %v1533_v61 = vld [vmem:[#allocation7 + $0x58] sm:$0xff] }
 0x647   :  { %v2337_v4 = vpop.eup %2336 }
 0x648   :  { %v2339_v63 = vpop.eup %2338  ;;  %v1151_v22 = vadd.f32 1.0, %v2337_v4  ;;  %v1534_v4 = vld [vmem:[#allocation7 + $0x60] sm:$0xff] }
 0x649   :  { %v1157_v2 = vadd.f32 1.0, %v2339_v63  ;;  %v2341_v3 = vpop.eup %2340  ;;  %v2237_v63 = vpack.c.bf16 %v1533_v61, %v1532_v60 }
 0x64a   :  { %2344 = vrcp.f32 %v1151_v22  ;;  %v2343_v5 = vpop.eup %2342  ;;  %v1164_v13 = vadd.f32 1.0, %v2341_v3  ;;  %v1535_v22 = vld [vmem:[#allocation7 + $0x68] sm:$0xff]  ;;  %v1536_v3 = vld [vmem:[#allocation7 + $0x70] sm:$0xff] }
 0x64b   :  { %2346 = vrcp.f32 %v1157_v2  ;;  %v2240_v2 = vpack.c.bf16 %v1535_v22, %v1534_v4 }
 0x64c   :  { %2348 = vrcp.f32 %v1164_v13 }
 0x654   :  { %v2345_v6 = vpop.eup %2344 }
 0x655   :  { %v2347_v11 = vpop.eup %2346  ;;  %v1168_v12 = vmul.f32 %v2345_v6, %v2343_v5  ;;  %v1537_v5 = vld [vmem:[#allocation7 + $0x78] sm:$0xff] }
 0x656   :  { %v1167_v16 = vmul.f32 %v2347_v11, %v2845_v23  ;;  %v2349_v20 = vpop.eup %2348  ;;  %v1522_v23 = vld [vmem:[#allocation7] sm:$0xff]  ;;  %v2243_v6 = vpack.c.bf16 %v1537_v5, %v1536_v3 }
 0x657   :  { %v2222_v43 = vpack.c.bf16 %v1523_v38, %v1522_v23  ;;  %v1348_v11 = vld [vmem:[#allocation2 + $0xe0] sm:$0xff] }
 0x658   :  { %v2883_v19 = vadd.f32 %v1168_v12, %v1167_v16  ;;  %v1349_v12 = vld [vmem:[#allocation2 + $0xe8] sm:$0xff] }
 0x65a   :  { %2350 = vtanh.f32 %v2883_v19 }
 0x664   :  { %v2351_v21 = vpop.eup %2350 }
 0x665   :  { %v1171_v36 = vmul.f32 %v2351_v21, %v2349_v20 }
 0x667   :  { %1242 = vmatmul.mubr.f32.vlgmr.msra.gmra.mrb[12].mxu0 %v1171_v36  ;;  %1313 = vmatmul.mubr.f32.vlgmr.msra.gmra.mrb[12].mxu1 %v1171_v36 }
 0x668   :  { %2160 = vmatpush1.bf16.msra.mxu0 %v2561_v8  ;;  %2192 = vmatpush1.bf16.msra.mxu1 %v2574_v25  ;;  %v1173_v8 = vld [vmem:[#allocation2 + $0xc0] sm:$0xff] }
 0x669   :  { %2162 = vmatprep.subr.bf16.mxu0 %v2563_v9  ;;  %2194 = vmatprep.subr.bf16.mxu1 %v2584_v33  ;;  %v1174_v9 = vld [vmem:[#allocation2 + $0xc8] sm:$0xff] }
 0x66a   :  { %1416 = vmatprep.mubr.f32.mxu0 %v2485_v0  ;;  %1487 = vmatprep.mubr.f32.mxu1 %v2485_v0 }
 0x66c   :  { %2164 = vmatpush1.bf16.msra.mxu0 %v2567_v14  ;;  %2196 = vmatpush1.bf16.msra.mxu1 %v2586_v37 }
 0x66d   :  { %2166 = vmatprep.subr.bf16.mxu0 %v2570_v17  ;;  %2198 = vmatprep.subr.bf16.mxu1 %v2592_v45  ;;  %v1176_v45 = vld [vmem:[#allocation2 + $0xd8] sm:$0xff] }
 0x670   :  { %2168 = vmatpush1.bf16.msra.mxu0 %v2577_v26  ;;  %2200 = vmatpush1.bf16.msra.mxu1 %v2598_v48  ;;  %v1175_v48 = vld [vmem:[#allocation2 + $0xd0] sm:$0xff] }
 0x671   :  { %2170 = vmatprep.subr.bf16.mxu0 %v2581_v30  ;;  %2202 = vmatprep.subr.bf16.mxu1 %v2601_v52 }
 0x674   :  { %2172 = vmatpush1.bf16.msra.mxu0 %v2590_v42  ;;  %2204 = vmatpush1.bf16.msra.mxu1 %v2610_v62 }
 0x675   :  { %2174 = vmatprep.subr.bf16.mxu0 %v2595_v46  ;;  %2206 = vmatprep.subr.bf16.mxu1 %v2613_v1 }
 0x678   :  { %2176 = vmatpush1.bf16.msra.mxu0 %v2604_v55  ;;  %2208 = vmatpush1.bf16.msra.mxu1 %v2622_v15 }
 0x679   :  { %2178 = vmatprep.subr.bf16.mxu0 %v2607_v58  ;;  %2210 = vmatprep.subr.bf16.mxu1 %v2625_v18 }
 0x67c   :  { %2180 = vmatpush1.bf16.msra.mxu0 %v2616_v7  ;;  %2212 = vmatpush1.bf16.msra.mxu1 %v2634_v31 }
 0x67d   :  { %2182 = vmatprep.subr.bf16.mxu0 %v2619_v10  ;;  %2214 = vmatprep.subr.bf16.mxu1 %v2637_v32 }
 0x680   :  { %2184 = vmatpush1.bf16.msra.mxu0 %v2628_v24  ;;  %2216 = vmatpush1.bf16.msra.mxu1 %v2644_v40 }
 0x681   :  { %2186 = vmatprep.subr.bf16.mxu0 %v2631_v27  ;;  %2218 = vmatprep.subr.bf16.mxu1 %v2647_v41 }
 0x684   :  { %2188 = vmatpush1.bf16.msra.mxu0 %v2640_v39  ;;  %2220 = vmatpush1.bf16.msra.mxu1 %v2651_v47 }
 0x685   :  { %2221 = vmatprep.subr.bf16.mxu0 %v2486_v28 }
 0x73a   :  { %v1243_v14 = vpop.f32.mrb[12].mxu0  ;;  %v1314_v17 = vpop.f32.mrb[12].mxu1 }
 0x73b   :  { %v1319_v25 = vadd.f32 %v1243_v14, %v1173_v8  ;;  %v1245_v26 = vpop.f32.mrb[13].mxu0  ;;  %v1316_v30 = vpop.f32.mrb[13].mxu1  ;;  %v1321_v55 = vadd.f32 %v1314_v17, %v1175_v48  ;;  %v1350_v17 = vld [vmem:[#allocation2 + $0xf0] sm:$0xff] }
 0x73c   :  { %v1320_v33 = vadd.f32 %v1245_v26, %v1174_v9  ;;  %v1322_v46 = vadd.f32 %v1316_v30, %v1176_v45 }
 0x73d   :  { %v1650_v37 = vmul.f32 -1.442695, %v1319_v25 }
 0x73e   :  { %v1651_v42 = vmul.f32 -1.442695, %v1320_v33  ;;  %v1652_v52 = vmul.f32 -1.442695, %v1322_v46 }
 0x73f   :  { %2352 = vpow2.f32 %v1650_v37 }
 0x740   :  { %2354 = vpow2.f32 %v1651_v42 }
 0x741   :  { %2356 = vpow2.f32 %v1652_v52 }
 0x742   :  { %2358 = vtanh.f32 %v1321_v55 }
 0x749   :  { %v2353_v58 = vpop.eup %2352 }
 0x74a   :  { %v2355_v62 = vpop.eup %2354  ;;  %v1326_v1 = vadd.f32 1.0, %v2353_v58 }
 0x74b   :  { %v1332_v7 = vadd.f32 1.0, %v2355_v62  ;;  %v2357_v10 = vpop.eup %2356 }
 0x74c   :  { %2360 = vrcp.f32 %v1326_v1  ;;  %v2359_v15 = vpop.eup %2358  ;;  %v1339_v31 = vadd.f32 1.0, %v2357_v10 }
 0x74d   :  { %2362 = vrcp.f32 %v1332_v7 }
 0x74e   :  { %2364 = vrcp.f32 %v1339_v31 }
 0x756   :  { %v2361_v18 = vpop.eup %2360 }
 0x757   :  { %v2363_v24 = vpop.eup %2362  ;;  %v1343_v27 = vmul.f32 %v2361_v18, %v2359_v15  ;;  %v1656_v18 = vld [vmem:[%s2942_s3] ss:$0 sm:$0xff] }
 0x758   :  { %v1342_v32 = vmul.f32 %v2363_v24, %v2883_v19  ;;  %v2365_v40 = vpop.eup %2364 }
 0x75a   :  { %v2919_v39 = vadd.f32 %v1343_v27, %v1342_v32 }
 0x75c   :  { %2366 = vtanh.f32 %v2919_v39 }
 0x766   :  { %v2367_v41 = vpop.eup %2366 }
 0x767   :  { %v1346_v47 = vmul.f32 %v2367_v41, %v2365_v40 }
 0x769   :  { %1417 = vmatmul.mubr.f32.vlgmr.msra.gmra.mrb[14].mxu0 %v1346_v47  ;;  %1488 = vmatmul.mubr.f32.vlgmr.msra.gmra.mrb[14].mxu1 %v1346_v47 }
 0x76a   :  { %2223 = vmatpush3.bf16.msra.mxu0 %v2222_v43  ;;  %1706 = vmatprep.mubr.msk.f32.mxu0 %vm2487_vm0, %v2485_v0  ;;  %v1351_v0 = vld [vmem:[#allocation2 + $0xf8] sm:$0xff] }
 0x76b   :  { %2224 = vmatprep.subr.bf16.mxu0 %v2486_v28 }
 0x76e   :  { %2226 = vmatpush3.bf16.msra.mxu0 %v2225_v35 }
 0x76f   :  { %2227 = vmatprep.subr.bf16.mxu0 %v2486_v28 }
 0x772   :  { %2229 = vmatpush3.bf16.msra.mxu0 %v2228_v50 }
 0x773   :  { %2230 = vmatprep.subr.bf16.mxu0 %v2486_v28 }
 0x776   :  { %2232 = vmatpush3.bf16.msra.mxu0 %v2231_v54 }
 0x777   :  { %2233 = vmatprep.subr.bf16.mxu0 %v2486_v28 }
 0x77a   :  { %2235 = vmatpush3.bf16.msra.mxu0 %v2234_v59 }
 0x77b   :  { %2236 = vmatprep.subr.bf16.mxu0 %v2486_v28 }
 0x77e   :  { %2238 = vmatpush3.bf16.msra.mxu0 %v2237_v63 }
 0x77f   :  { %2239 = vmatprep.subr.bf16.mxu0 %v2486_v28 }
 0x782   :  { %2241 = vmatpush3.bf16.msra.mxu0 %v2240_v2 }
 0x783   :  { %2242 = vmatprep.subr.bf16.mxu0 %v2486_v28 }
 0x786   :  { %2244 = vmatpush3.bf16.msra.mxu0 %v2243_v6 }
 0x83c   :  { %v1418_v13 = vpop.f32.mrb[14].mxu0  ;;  %v1489_v16 = vpop.f32.mrb[14].mxu1 }
 0x83d   :  { %v1494_v19 = vadd.f32 %v1418_v13, %v1348_v11  ;;  %v1420_v20 = vpop.f32.mrb[15].mxu0  ;;  %v1491_v21 = vpop.f32.mrb[15].mxu1  ;;  %v1496_v26 = vadd.f32 %v1489_v16, %v1350_v17 }
 0x83e   :  { %v1495_v36 = vadd.f32 %v1420_v20, %v1349_v12  ;;  %v1497_v14 = vadd.f32 %v1491_v21, %v1351_v0 }
 0x83f   :  { %v1653_v8 = vmul.f32 -1.442695, %v1494_v19 }
 0x840   :  { %v1654_v9 = vmul.f32 -1.442695, %v1495_v36  ;;  %v1655_v25 = vmul.f32 -1.442695, %v1497_v14 }
 0x841   :  { %2368 = vpow2.f32 %v1653_v8 }
 0x842   :  { %2370 = vpow2.f32 %v1654_v9 }
 0x843   :  { %2372 = vpow2.f32 %v1655_v25 }
 0x844   :  { %2374 = vtanh.f32 %v1496_v26 }
 0x84b   :  { %v2369_v30 = vpop.eup %2368 }
 0x84c   :  { %v2371_v33 = vpop.eup %2370  ;;  %v1501_v37 = vadd.f32 1.0, %v2369_v30 }
 0x84d   :  { %v1507_v42 = vadd.f32 1.0, %v2371_v33  ;;  %v2373_v45 = vpop.eup %2372 }
 0x84e   :  { %2376 = vrcp.f32 %v1501_v37  ;;  %v2375_v46 = vpop.eup %2374  ;;  %v1514_v58 = vadd.f32 1.0, %v2373_v45 }
 0x84f   :  { %2378 = vrcp.f32 %v1507_v42 }
 0x850   :  { %2380 = vrcp.f32 %v1514_v58 }
 0x858   :  { %v2377_v48 = vpop.eup %2376 }
 0x859   :  { %v2379_v52 = vpop.eup %2378  ;;  %v1518_v55 = vmul.f32 %v2377_v48, %v2375_v46 }
 0x85a   :  { %v1517_v62 = vmul.f32 %v2379_v52, %v2919_v39  ;;  %v2381_v7 = vpop.eup %2380 }
 0x85c   :  { %v1519_v1 = vadd.f32 %v1518_v55, %v1517_v62 }
 0x85e   :  { %2382 = vtanh.f32 %v1519_v1 }
 0x868   :  { %v2383_v10 = vpop.eup %2382 }
 0x869   :  { %v1521_v15 = vmul.f32 %v2383_v10, %v2381_v7 }
 0x86b   :  { %1707 = vmatmul.mubr.f32.vlgmr.msra.gmra.mrb[16].mxu0 %v1521_v15 }
 0x93e   :  { %v1611_v24 = vpop.f32.mrb[16].mxu0 }
 0x93f   :  { %v1612_v27 = vadd.f32 %v1656_v18, %v1611_v24  ;;  %v1708_v31 = vpop.f32.mrb[17].mxu0 }
 0x941   :  { %1615 = vst [vmem:[#allocation8] sm:$0xff] %v1612_v27 }
 0x942   :  { %2461 = shalt.err (!%p2458_p0)
}
 0x943   :  { %s2462_s7 = scalar_lea.hbm %s2943_s4, 128 }
 0x944   :  { %p2463_p1 = scmp.ne.s32.totalorder %s2943_s4, %s2462_s7  ;;  %p2466_p2 = scmp.lt.u32.totalorder %s2462_s7, %s2943_s4 }
 0x946   :  { %p2468_p3 = pnand %p2466_p2, %p2463_p1 }
 0x948   :  { %2471 = shalt.err (!%p2468_p3)
}
 0x949   :  { %1625 = dma.vmem_to_hbm [thread:$0]  %s1623_s29, 128, %s2943_s4, [#allocation4]  }
 0x94a   :  { %2476 = dma.done.wait [#allocation4], 128  }
 0x94b   :  { %2477 = vsyncadd [#allocation4], 4294967168 }
 0x94c   :  { %1629 = vsyncpa [#allocation3], 1 }
 0x94d   :  { %1630 = vsyncpa [#allocation6], 1 }
 0x94e   :  { %1631 = vsyncpa [#allocation4], 1 }

</bundles_post_ra>
